<compile_context>
chip_gen: v6e
topology: v6e:2x2x1
jax: 0.10.0
libtpu: 0.0.40
codegen_flags: <defaults>
</compile_context>

<pallas_src>
import jax
import jax.numpy as jnp
import numpy as np
from jax.experimental import pallas as pl
from jax.experimental.pallas import tpu as pltpu

# ---- small synthetic dimensions (consistent with the module's forward) ----
VOCAB_SIZE = 50
WORD_DIM = 16      # torch default 300
QUES_DIM = 32      # torch default 1024 (GRU hidden size H)
V_DIM = 64         # torch default 2048
SCORE_DIM = 32     # torch default 512
B = 2              # batch
T = 8              # question sequence length
K = 16             # number of visual regions


# ------------------------------------------------------------------
# Fused kernel: GRU over the question sequence, then ScoringFunction + W head +
# sigmoid + sum over regions. Grid-less; packed slabs live whole in VMEM, the
# visual features are DMA'd manually and hidden behind the recurrence.
# ------------------------------------------------------------------
def make_soft_count_kernel(t_len, batch, k_regions, d, gp, v_dim, score_dim):
    def kernel(x_ref, gru_ref, score_ref, bs_ref, v_hbm, out_ref, v_buf, v_sem):
        # ---- start the (bulk) v_flat HBM->VMEM copy; consumed only after the GRU ----
        v_cp = pltpu.make_async_copy(v_hbm, v_buf, v_sem)
        v_cp.start()

        # ---------------- GRU (last hidden state) ----------------
        # GRU slab layout (rows): [0:d) wih | [d:d+gp) whh | row d+gp bih | row d+gp+8 bhh
        wih = gru_ref[0:d, :]                          # (D, 3*GP)
        whh = gru_ref[d:d + gp, :]                     # (GP, 3*GP)  rows >= H are zero
        bih = gru_ref[d + gp:d + gp + 1, :]            # (1, 3*GP)
        bhh = gru_ref[d + gp + 8:d + gp + 9, :]        # (1, 3*GP)

        # Hoisted input projection: one matmul covers all T steps.
        xp = jnp.dot(x_ref[...], wih,
                     preferred_element_type=jnp.float32) + bih        # (T*B, 3*GP)

        # Hidden state carried at padded width GP; padded lanes stay exactly 0.
        hstate = jnp.zeros((batch, gp), jnp.float32)
        for t in range(t_len):                         # fully unrolled (T is tiny/static)
            xg = xp[t * batch:(t + 1) * batch, :]      # (B, 3*GP)
            hg = jnp.dot(hstate, whh,
                         preferred_element_type=jnp.float32) + bhh    # (B, 3*GP)
            # Fused r/z sigmoid over the first 2*GP lanes (one EUP push), then
            # lane-tile-aligned slices at offsets 0 / GP / 2*GP.
            rz = jax.nn.sigmoid(xg[:, 0:2 * gp] + hg[:, 0:2 * gp])
            r = rz[:, 0:gp]
            z = rz[:, gp:2 * gp]
            n = jnp.tanh(xg[:, 2 * gp:3 * gp] + r * hg[:, 2 * gp:3 * gp])
            hstate = (1.0 - z) * n + z * hstate        # (B, GP)  == q_emb (lanes 0:H)

        # ------------- Scoring + W head + sigmoid + sum -------------
        # Scoring slab layout (rows): [0:v_dim) wv | [v_dim:v_dim+gp) wq |
        #   row v_dim+gp bv | row v_dim+gp+8 bq | row v_dim+gp+16 ws
        wv = score_ref[0:v_dim, :]                     # (V, S)
        wq = score_ref[v_dim:v_dim + gp, :]            # (GP, S)  rows >= H are zero
        bv = score_ref[v_dim + gp:v_dim + gp + 1, :]   # (1, S)
        bq = score_ref[v_dim + gp + 8:v_dim + gp + 9, :]
        ws = score_ref[v_dim + gp + 16:v_dim + gp + 17, :]

        qp = jnp.dot(hstate, wq, preferred_element_type=jnp.float32) + bq   # (B, S)
        qp = jnp.where(qp > 0, qp, 0.01 * qp)          # LeakyReLU(0.01)
        qpw = qp * ws                                  # fold W-head weight into q proj

        # Now (and only now) we need the visual features.
        v_cp.wait()
        vp = jnp.dot(v_buf[...], wv,
                     preferred_element_type=jnp.float32) + bv               # (B*K, S)
        vp = jnp.where(vp > 0, vp, 0.01 * vp)          # LeakyReLU(0.01)
        vp3 = vp.reshape(batch, k_regions, score_dim)  # splits on sublane-tile bounds

        logits = jnp.sum(vp3 * qpw[:, None, :], axis=-1) + bs_ref[0, 0]     # (B, K)
        soft = jax.nn.sigmoid(logits)
        out_ref[...] = jnp.sum(soft, axis=1, keepdims=True)                 # (B, 1)

    return kernel


# ------------------------------------------------------------------
# Full SoftCount forward (embedding gather / transpose / slab packing in plain JAX).
# ------------------------------------------------------------------
def soft_count_forward(v_emb, questions, p):
    d = p['wr'].shape[0]          # word dim
    h = p['ur'].shape[0]          # GRU hidden size
    s = p['wv'].shape[1]          # score dim
    gp = -(-h // 128) * 128       # per-gate lane padding (128-lane tile aligned)

    def gate_pack(a, b, c):
        padg = lambda w: jnp.pad(w, ((0, 0), (0, gp - w.shape[1])))
        return jnp.concatenate([padg(a), padg(b), padg(c)], axis=1)

    def row_pad(w, rows):
        return jnp.pad(w, ((0, rows - w.shape[0]), (0, 0)))

    # ---- GRU slab: [wih | whh | bih | bhh], gates padded to GP lanes each ----
    wih = gate_pack(p['wr'], p['wz'], p['wn'])                     # (D, 3*GP)
    whh = row_pad(gate_pack(p['ur'], p['uz'], p['un']), gp)        # (GP, 3*GP)
    bih = row_pad(gate_pack(p['bir'], p['biz'], p['bin']), 8)      # (8, 3*GP)
    bhh = row_pad(gate_pack(p['bhr'], p['bhz'], p['bhn']), 8)      # (8, 3*GP)
    gru_slab = jnp.concatenate([wih, whh, bih, bhh], axis=0)       # (D+GP+16, 3*GP)

    # ---- Scoring slab: [wv | wq | bv | bq | ws] ----
    score_slab = jnp.concatenate([
        p['wv'],                                                   # (V, S)
        row_pad(p['wq'], gp),                                      # (GP, S)
        row_pad(p['bv'], 8), row_pad(p['bq'], 8), row_pad(p['ws'], 8),
    ], axis=0)                                                     # (V+GP+24, S)

    # questions.t() -> embedding lookup -> (T, B, WORD_DIM) -> time-major flatten
    x_seq = jnp.take(p['embedding'], questions.T, axis=0)          # (T, B, D)
    t_len, batch, _ = x_seq.shape
    x_flat = x_seq.reshape(t_len * batch, d).astype(jnp.float32)

    bsz, k_regions, v_dim = v_emb.shape
    v_flat = v_emb.reshape(bsz * k_regions, v_dim).astype(jnp.float32)

    kernel = make_soft_count_kernel(t_len, batch, k_regions, d, gp, v_dim, s)

    vmem = pl.BlockSpec(memory_space=pltpu.MemorySpace.VMEM)
    smem = pl.BlockSpec(memory_space=pltpu.MemorySpace.SMEM)
    hbm = pl.BlockSpec(memory_space=pl.ANY)

    out = pl.pallas_call(
        kernel,
        out_shape=jax.ShapeDtypeStruct((batch, 1), jnp.float32),
        in_specs=[vmem, vmem, vmem, smem, hbm],
        out_specs=vmem,
        scratch_shapes=[
            pltpu.VMEM((bsz * k_regions, v_dim), jnp.float32),     # v_flat landing buf
            pltpu.SemaphoreType.DMA,                               # its completion sem
        ],
    )(x_flat, gru_slab, score_slab, p['bs'], v_flat)
    return out[:, 0]                                               # (B,)


# ------------------------------------------------------------------
# Pure-JAX reference for correctness checking.
# ------------------------------------------------------------------
def reference_forward(v_emb, questions, p):
    x_seq = jnp.take(p['embedding'], questions.T, axis=0)

    def step(h, x):
        r = jax.nn.sigmoid(x @ p['wr'] + p['bir'] + h @ p['ur'] + p['bhr'])
        z = jax.nn.sigmoid(x @ p['wz'] + p['biz'] + h @ p['uz'] + p['bhz'])
        n = jnp.tanh(x @ p['wn'] + p['bin'] + r * (h @ p['un'] + p['bhn']))
        return (1.0 - z) * n + z * h, None

    h0 = jnp.zeros((questions.shape[0], QUES_DIM), jnp.float32)
    q_emb, _ = jax.lax.scan(step, h0, x_seq)

    vp = jax.nn.leaky_relu(v_emb @ p['wv'] + p['bv'], 0.01)
    qp = jax.nn.leaky_relu(q_emb @ p['wq'] + p['bq'], 0.01)
    s = vp * qp[:, None, :]
    logits = (s * p['ws']).sum(-1) + p['bs'][0, 0]
    return jax.nn.sigmoid(logits).sum(axis=1)


def init_params(key):
    ks = jax.random.split(key, 20)

    def w(k, shape, scale=0.1):
        return scale * jax.random.normal(k, shape, dtype=jnp.float32)

    emb = w(ks[0], (VOCAB_SIZE + 1, WORD_DIM))
    emb = emb.at[VOCAB_SIZE].set(0.0)   # padding_idx=VOCAB_SIZE

    # weight_norm(dim=None) at init is equivalent to the raw weight -> plain init.
    return dict(
        embedding=emb,
        wr=w(ks[1], (WORD_DIM, QUES_DIM)), wz=w(ks[2], (WORD_DIM, QUES_DIM)),
        wn=w(ks[3], (WORD_DIM, QUES_DIM)),
        ur=w(ks[4], (QUES_DIM, QUES_DIM)), uz=w(ks[5], (QUES_DIM, QUES_DIM)),
        un=w(ks[6], (QUES_DIM, QUES_DIM)),
        bir=w(ks[7], (1, QUES_DIM), 0.01), biz=w(ks[8], (1, QUES_DIM), 0.01),
        bin=w(ks[9], (1, QUES_DIM), 0.01), bhr=w(ks[10], (1, QUES_DIM), 0.01),
        bhz=w(ks[11], (1, QUES_DIM), 0.01), bhn=w(ks[12], (1, QUES_DIM), 0.01),
        wv=w(ks[13], (V_DIM, SCORE_DIM)), bv=w(ks[14], (1, SCORE_DIM), 0.01),
        wq=w(ks[15], (QUES_DIM, SCORE_DIM)), bq=w(ks[16], (1, SCORE_DIM), 0.01),
        ws=w(ks[17], (1, SCORE_DIM)), bs=w(ks[18], (1, 1), 0.01),
    )


if __name__ == "__main__":
    key = jax.random.PRNGKey(0)
    kq, kv, kp = jax.random.split(key, 3)

    questions = jax.random.randint(kq, (B, T), 0, VOCAB_SIZE + 1, dtype=jnp.int32)
    v_emb = jax.random.normal(kv, (B, K, V_DIM), dtype=jnp.float32)
    params = init_params(kp)

    fwd = jax.jit(soft_count_forward)
    C = fwd(v_emb, questions, params)
    C = jax.block_until_ready(C)

    C_ref = reference_forward(v_emb, questions, params)

    assert C.shape == (B,), C.shape
    assert bool(jnp.all(jnp.isfinite(C)))
    np.testing.assert_allclose(np.asarray(C), np.asarray(C_ref), rtol=1e-3, atol=1e-3)

    print("KERNEL_OK")
</pallas_src>

<mosaic_0001>
module attributes {stable_mosaic.version = 11 : i64} {
  func.func @kernel(%arg0: memref<16x16xf32, #tpu.memory_space<vmem>>, %arg1: memref<160x384xf32, #tpu.memory_space<vmem>>, %arg2: memref<216x32xf32, #tpu.memory_space<vmem>>, %arg3: memref<1x1xf32, #tpu.memory_space<smem>>, %arg4: memref<32x64xf32, #tpu.memory_space<any>>, %arg5: memref<2x1xf32, #tpu.memory_space<vmem>>, %arg6: memref<32x64xf32, #tpu.memory_space<vmem>>, %arg7: memref<!tpu.dma_semaphore, #tpu.memory_space<semaphore_mem>>) attributes {dimension_semantics = [], scalar_prefetch = 0 : i64, scratch_operands = 2 : i64, tpu.core_type = #tpu.core_type<tc>} {
    tpu.enqueue_dma source(%arg4 : memref<32x64xf32, #tpu.memory_space<any>>) target(%arg6 : memref<32x64xf32, #tpu.memory_space<vmem>>) target_semaphore(%arg7 : memref<!tpu.dma_semaphore, #tpu.memory_space<semaphore_mem>>)
    %c0 = arith.constant 0 : index
    %c0_0 = arith.constant 0 : index
    %0 = vector.load %arg1[%c0, %c0_0] : memref<160x384xf32, #tpu.memory_space<vmem>>, vector<16x384xf32>
    %c16 = arith.constant 16 : index
    %c0_1 = arith.constant 0 : index
    %1 = vector.load %arg1[%c16, %c0_1] : memref<160x384xf32, #tpu.memory_space<vmem>>, vector<128x384xf32>
    %c144 = arith.constant 144 : index
    %c0_2 = arith.constant 0 : index
    %2 = vector.load %arg1[%c144, %c0_2] : memref<160x384xf32, #tpu.memory_space<vmem>>, vector<1x384xf32>
    %c152 = arith.constant 152 : index
    %c0_3 = arith.constant 0 : index
    %3 = vector.load %arg1[%c152, %c0_3] : memref<160x384xf32, #tpu.memory_space<vmem>>, vector<1x384xf32>
    %c0_4 = arith.constant 0 : index
    %c0_5 = arith.constant 0 : index
    %4 = vector.load %arg0[%c0_4, %c0_5] : memref<16x16xf32, #tpu.memory_space<vmem>>, vector<16x16xf32>
    %cst = arith.constant dense<0.000000e+00> : vector<16x384xf32>
    %5 = tpu.matmul %4, %0, %cst {dimension_numbers = #tpu.dot_dimension_numbers<[1], [0], [0], [1], [0, 0, 1, 1], [], []>} : vector<16x16xf32>, vector<16x384xf32>, vector<16x384xf32> -> vector<16x384xf32>
    %6 = vector.broadcast %2 : vector<1x384xf32> to vector<16x384xf32>
    %7 = arith.addf %5, %6 : vector<16x384xf32>
    %cst_6 = arith.constant 0.000000e+00 : f32
    %8 = vector.broadcast %cst_6 : f32 to vector<2x128xf32>
    %9 = vector.extract_strided_slice %7 {offsets = [0, 0], sizes = [2, 384], strides = [1, 1]} : vector<16x384xf32> to vector<2x384xf32>
    %cst_7 = arith.constant dense<0.000000e+00> : vector<2x384xf32>
    %10 = tpu.matmul %8, %1, %cst_7 {dimension_numbers = #tpu.dot_dimension_numbers<[1], [0], [0], [1], [0, 0, 1, 1], [], []>} : vector<2x128xf32>, vector<128x384xf32>, vector<2x384xf32> -> vector<2x384xf32>
    %11 = vector.broadcast %3 : vector<1x384xf32> to vector<2x384xf32>
    %12 = arith.addf %10, %11 : vector<2x384xf32>
    %13 = vector.extract_strided_slice %9 {offsets = [0, 0], sizes = [2, 256], strides = [1, 1]} : vector<2x384xf32> to vector<2x256xf32>
    %14 = vector.extract_strided_slice %12 {offsets = [0, 0], sizes = [2, 256], strides = [1, 1]} : vector<2x384xf32> to vector<2x256xf32>
    %15 = arith.addf %13, %14 : vector<2x256xf32>
    %16 = arith.negf %15 : vector<2x256xf32>
    %17 = math.exp %16 : vector<2x256xf32>
    %cst_8 = arith.constant 1.000000e+00 : f32
    %18 = vector.broadcast %cst_8 : f32 to vector<2x256xf32>
    %19 = arith.addf %18, %17 : vector<2x256xf32>
    %20 = arith.divf %18, %19 : vector<2x256xf32>
    %21 = vector.extract_strided_slice %20 {offsets = [0, 0], sizes = [2, 128], strides = [1, 1]} : vector<2x256xf32> to vector<2x128xf32>
    %22 = vector.extract_strided_slice %20 {offsets = [0, 128], sizes = [2, 128], strides = [1, 1]} : vector<2x256xf32> to vector<2x128xf32>
    %23 = vector.extract_strided_slice %9 {offsets = [0, 256], sizes = [2, 128], strides = [1, 1]} : vector<2x384xf32> to vector<2x128xf32>
    %24 = vector.extract_strided_slice %12 {offsets = [0, 256], sizes = [2, 128], strides = [1, 1]} : vector<2x384xf32> to vector<2x128xf32>
    %25 = arith.mulf %21, %24 : vector<2x128xf32>
    %26 = arith.addf %23, %25 : vector<2x128xf32>
    %27 = math.tanh %26 : vector<2x128xf32>
    %cst_9 = arith.constant 1.000000e+00 : f32
    %28 = vector.broadcast %cst_9 : f32 to vector<2x128xf32>
    %29 = arith.subf %28, %22 : vector<2x128xf32>
    %30 = arith.mulf %29, %27 : vector<2x128xf32>
    %31 = arith.mulf %22, %8 : vector<2x128xf32>
    %32 = arith.addf %30, %31 : vector<2x128xf32>
    %33 = vector.extract_strided_slice %7 {offsets = [2, 0], sizes = [2, 384], strides = [1, 1]} : vector<16x384xf32> to vector<2x384xf32>
    %cst_10 = arith.constant dense<0.000000e+00> : vector<2x384xf32>
    %34 = tpu.matmul %32, %1, %cst_10 {dimension_numbers = #tpu.dot_dimension_numbers<[1], [0], [0], [1], [0, 0, 1, 1], [], []>} : vector<2x128xf32>, vector<128x384xf32>, vector<2x384xf32> -> vector<2x384xf32>
    %35 = vector.broadcast %3 : vector<1x384xf32> to vector<2x384xf32>
    %36 = arith.addf %34, %35 : vector<2x384xf32>
    %37 = vector.extract_strided_slice %33 {offsets = [0, 0], sizes = [2, 256], strides = [1, 1]} : vector<2x384xf32> to vector<2x256xf32>
    %38 = vector.extract_strided_slice %36 {offsets = [0, 0], sizes = [2, 256], strides = [1, 1]} : vector<2x384xf32> to vector<2x256xf32>
    %39 = arith.addf %37, %38 : vector<2x256xf32>
    %40 = arith.negf %39 : vector<2x256xf32>
    %41 = math.exp %40 : vector<2x256xf32>
    %cst_11 = arith.constant 1.000000e+00 : f32
    %42 = vector.broadcast %cst_11 : f32 to vector<2x256xf32>
    %43 = arith.addf %42, %41 : vector<2x256xf32>
    %44 = arith.divf %42, %43 : vector<2x256xf32>
    %45 = vector.extract_strided_slice %44 {offsets = [0, 0], sizes = [2, 128], strides = [1, 1]} : vector<2x256xf32> to vector<2x128xf32>
    %46 = vector.extract_strided_slice %44 {offsets = [0, 128], sizes = [2, 128], strides = [1, 1]} : vector<2x256xf32> to vector<2x128xf32>
    %47 = vector.extract_strided_slice %33 {offsets = [0, 256], sizes = [2, 128], strides = [1, 1]} : vector<2x384xf32> to vector<2x128xf32>
    %48 = vector.extract_strided_slice %36 {offsets = [0, 256], sizes = [2, 128], strides = [1, 1]} : vector<2x384xf32> to vector<2x128xf32>
    %49 = arith.mulf %45, %48 : vector<2x128xf32>
    %50 = arith.addf %47, %49 : vector<2x128xf32>
    %51 = math.tanh %50 : vector<2x128xf32>
    %cst_12 = arith.constant 1.000000e+00 : f32
    %52 = vector.broadcast %cst_12 : f32 to vector<2x128xf32>
    %53 = arith.subf %52, %46 : vector<2x128xf32>
    %54 = arith.mulf %53, %51 : vector<2x128xf32>
    %55 = arith.mulf %46, %32 : vector<2x128xf32>
    %56 = arith.addf %54, %55 : vector<2x128xf32>
    %57 = vector.extract_strided_slice %7 {offsets = [4, 0], sizes = [2, 384], strides = [1, 1]} : vector<16x384xf32> to vector<2x384xf32>
    %cst_13 = arith.constant dense<0.000000e+00> : vector<2x384xf32>
    %58 = tpu.matmul %56, %1, %cst_13 {dimension_numbers = #tpu.dot_dimension_numbers<[1], [0], [0], [1], [0, 0, 1, 1], [], []>} : vector<2x128xf32>, vector<128x384xf32>, vector<2x384xf32> -> vector<2x384xf32>
    %59 = vector.broadcast %3 : vector<1x384xf32> to vector<2x384xf32>
    %60 = arith.addf %58, %59 : vector<2x384xf32>
    %61 = vector.extract_strided_slice %57 {offsets = [0, 0], sizes = [2, 256], strides = [1, 1]} : vector<2x384xf32> to vector<2x256xf32>
    %62 = vector.extract_strided_slice %60 {offsets = [0, 0], sizes = [2, 256], strides = [1, 1]} : vector<2x384xf32> to vector<2x256xf32>
    %63 = arith.addf %61, %62 : vector<2x256xf32>
    %64 = arith.negf %63 : vector<2x256xf32>
    %65 = math.exp %64 : vector<2x256xf32>
    %cst_14 = arith.constant 1.000000e+00 : f32
    %66 = vector.broadcast %cst_14 : f32 to vector<2x256xf32>
    %67 = arith.addf %66, %65 : vector<2x256xf32>
    %68 = arith.divf %66, %67 : vector<2x256xf32>
    %69 = vector.extract_strided_slice %68 {offsets = [0, 0], sizes = [2, 128], strides = [1, 1]} : vector<2x256xf32> to vector<2x128xf32>
    %70 = vector.extract_strided_slice %68 {offsets = [0, 128], sizes = [2, 128], strides = [1, 1]} : vector<2x256xf32> to vector<2x128xf32>
    %71 = vector.extract_strided_slice %57 {offsets = [0, 256], sizes = [2, 128], strides = [1, 1]} : vector<2x384xf32> to vector<2x128xf32>
    %72 = vector.extract_strided_slice %60 {offsets = [0, 256], sizes = [2, 128], strides = [1, 1]} : vector<2x384xf32> to vector<2x128xf32>
    %73 = arith.mulf %69, %72 : vector<2x128xf32>
    %74 = arith.addf %71, %73 : vector<2x128xf32>
    %75 = math.tanh %74 : vector<2x128xf32>
    %cst_15 = arith.constant 1.000000e+00 : f32
    %76 = vector.broadcast %cst_15 : f32 to vector<2x128xf32>
    %77 = arith.subf %76, %70 : vector<2x128xf32>
    %78 = arith.mulf %77, %75 : vector<2x128xf32>
    %79 = arith.mulf %70, %56 : vector<2x128xf32>
    %80 = arith.addf %78, %79 : vector<2x128xf32>
    %81 = vector.extract_strided_slice %7 {offsets = [6, 0], sizes = [2, 384], strides = [1, 1]} : vector<16x384xf32> to vector<2x384xf32>
    %cst_16 = arith.constant dense<0.000000e+00> : vector<2x384xf32>
    %82 = tpu.matmul %80, %1, %cst_16 {dimension_numbers = #tpu.dot_dimension_numbers<[1], [0], [0], [1], [0, 0, 1, 1], [], []>} : vector<2x128xf32>, vector<128x384xf32>, vector<2x384xf32> -> vector<2x384xf32>
    %83 = vector.broadcast %3 : vector<1x384xf32> to vector<2x384xf32>
    %84 = arith.addf %82, %83 : vector<2x384xf32>
    %85 = vector.extract_strided_slice %81 {offsets = [0, 0], sizes = [2, 256], strides = [1, 1]} : vector<2x384xf32> to vector<2x256xf32>
    %86 = vector.extract_strided_slice %84 {offsets = [0, 0], sizes = [2, 256], strides = [1, 1]} : vector<2x384xf32> to vector<2x256xf32>
    %87 = arith.addf %85, %86 : vector<2x256xf32>
    %88 = arith.negf %87 : vector<2x256xf32>
    %89 = math.exp %88 : vector<2x256xf32>
    %cst_17 = arith.constant 1.000000e+00 : f32
    %90 = vector.broadcast %cst_17 : f32 to vector<2x256xf32>
    %91 = arith.addf %90, %89 : vector<2x256xf32>
    %92 = arith.divf %90, %91 : vector<2x256xf32>
    %93 = vector.extract_strided_slice %92 {offsets = [0, 0], sizes = [2, 128], strides = [1, 1]} : vector<2x256xf32> to vector<2x128xf32>
    %94 = vector.extract_strided_slice %92 {offsets = [0, 128], sizes = [2, 128], strides = [1, 1]} : vector<2x256xf32> to vector<2x128xf32>
    %95 = vector.extract_strided_slice %81 {offsets = [0, 256], sizes = [2, 128], strides = [1, 1]} : vector<2x384xf32> to vector<2x128xf32>
    %96 = vector.extract_strided_slice %84 {offsets = [0, 256], sizes = [2, 128], strides = [1, 1]} : vector<2x384xf32> to vector<2x128xf32>
    %97 = arith.mulf %93, %96 : vector<2x128xf32>
    %98 = arith.addf %95, %97 : vector<2x128xf32>
    %99 = math.tanh %98 : vector<2x128xf32>
    %cst_18 = arith.constant 1.000000e+00 : f32
    %100 = vector.broadcast %cst_18 : f32 to vector<2x128xf32>
    %101 = arith.subf %100, %94 : vector<2x128xf32>
    %102 = arith.mulf %101, %99 : vector<2x128xf32>
    %103 = arith.mulf %94, %80 : vector<2x128xf32>
    %104 = arith.addf %102, %103 : vector<2x128xf32>
    %105 = vector.extract_strided_slice %7 {offsets = [8, 0], sizes = [2, 384], strides = [1, 1]} : vector<16x384xf32> to vector<2x384xf32>
    %cst_19 = arith.constant dense<0.000000e+00> : vector<2x384xf32>
    %106 = tpu.matmul %104, %1, %cst_19 {dimension_numbers = #tpu.dot_dimension_numbers<[1], [0], [0], [1], [0, 0, 1, 1], [], []>} : vector<2x128xf32>, vector<128x384xf32>, vector<2x384xf32> -> vector<2x384xf32>
    %107 = vector.broadcast %3 : vector<1x384xf32> to vector<2x384xf32>
    %108 = arith.addf %106, %107 : vector<2x384xf32>
    %109 = vector.extract_strided_slice %105 {offsets = [0, 0], sizes = [2, 256], strides = [1, 1]} : vector<2x384xf32> to vector<2x256xf32>
    %110 = vector.extract_strided_slice %108 {offsets = [0, 0], sizes = [2, 256], strides = [1, 1]} : vector<2x384xf32> to vector<2x256xf32>
    %111 = arith.addf %109, %110 : vector<2x256xf32>
    %112 = arith.negf %111 : vector<2x256xf32>
    %113 = math.exp %112 : vector<2x256xf32>
    %cst_20 = arith.constant 1.000000e+00 : f32
    %114 = vector.broadcast %cst_20 : f32 to vector<2x256xf32>
    %115 = arith.addf %114, %113 : vector<2x256xf32>
    %116 = arith.divf %114, %115 : vector<2x256xf32>
    %117 = vector.extract_strided_slice %116 {offsets = [0, 0], sizes = [2, 128], strides = [1, 1]} : vector<2x256xf32> to vector<2x128xf32>
    %118 = vector.extract_strided_slice %116 {offsets = [0, 128], sizes = [2, 128], strides = [1, 1]} : vector<2x256xf32> to vector<2x128xf32>
    %119 = vector.extract_strided_slice %105 {offsets = [0, 256], sizes = [2, 128], strides = [1, 1]} : vector<2x384xf32> to vector<2x128xf32>
    %120 = vector.extract_strided_slice %108 {offsets = [0, 256], sizes = [2, 128], strides = [1, 1]} : vector<2x384xf32> to vector<2x128xf32>
    %121 = arith.mulf %117, %120 : vector<2x128xf32>
    %122 = arith.addf %119, %121 : vector<2x128xf32>
    %123 = math.tanh %122 : vector<2x128xf32>
    %cst_21 = arith.constant 1.000000e+00 : f32
    %124 = vector.broadcast %cst_21 : f32 to vector<2x128xf32>
    %125 = arith.subf %124, %118 : vector<2x128xf32>
    %126 = arith.mulf %125, %123 : vector<2x128xf32>
    %127 = arith.mulf %118, %104 : vector<2x128xf32>
    %128 = arith.addf %126, %127 : vector<2x128xf32>
    %129 = vector.extract_strided_slice %7 {offsets = [10, 0], sizes = [2, 384], strides = [1, 1]} : vector<16x384xf32> to vector<2x384xf32>
    %cst_22 = arith.constant dense<0.000000e+00> : vector<2x384xf32>
    %130 = tpu.matmul %128, %1, %cst_22 {dimension_numbers = #tpu.dot_dimension_numbers<[1], [0], [0], [1], [0, 0, 1, 1], [], []>} : vector<2x128xf32>, vector<128x384xf32>, vector<2x384xf32> -> vector<2x384xf32>
    %131 = vector.broadcast %3 : vector<1x384xf32> to vector<2x384xf32>
    %132 = arith.addf %130, %131 : vector<2x384xf32>
    %133 = vector.extract_strided_slice %129 {offsets = [0, 0], sizes = [2, 256], strides = [1, 1]} : vector<2x384xf32> to vector<2x256xf32>
    %134 = vector.extract_strided_slice %132 {offsets = [0, 0], sizes = [2, 256], strides = [1, 1]} : vector<2x384xf32> to vector<2x256xf32>
    %135 = arith.addf %133, %134 : vector<2x256xf32>
    %136 = arith.negf %135 : vector<2x256xf32>
    %137 = math.exp %136 : vector<2x256xf32>
    %cst_23 = arith.constant 1.000000e+00 : f32
    %138 = vector.broadcast %cst_23 : f32 to vector<2x256xf32>
    %139 = arith.addf %138, %137 : vector<2x256xf32>
    %140 = arith.divf %138, %139 : vector<2x256xf32>
    %141 = vector.extract_strided_slice %140 {offsets = [0, 0], sizes = [2, 128], strides = [1, 1]} : vector<2x256xf32> to vector<2x128xf32>
    %142 = vector.extract_strided_slice %140 {offsets = [0, 128], sizes = [2, 128], strides = [1, 1]} : vector<2x256xf32> to vector<2x128xf32>
    %143 = vector.extract_strided_slice %129 {offsets = [0, 256], sizes = [2, 128], strides = [1, 1]} : vector<2x384xf32> to vector<2x128xf32>
    %144 = vector.extract_strided_slice %132 {offsets = [0, 256], sizes = [2, 128], strides = [1, 1]} : vector<2x384xf32> to vector<2x128xf32>
    %145 = arith.mulf %141, %144 : vector<2x128xf32>
    %146 = arith.addf %143, %145 : vector<2x128xf32>
    %147 = math.tanh %146 : vector<2x128xf32>
    %cst_24 = arith.constant 1.000000e+00 : f32
    %148 = vector.broadcast %cst_24 : f32 to vector<2x128xf32>
    %149 = arith.subf %148, %142 : vector<2x128xf32>
    %150 = arith.mulf %149, %147 : vector<2x128xf32>
    %151 = arith.mulf %142, %128 : vector<2x128xf32>
    %152 = arith.addf %150, %151 : vector<2x128xf32>
    %153 = vector.extract_strided_slice %7 {offsets = [12, 0], sizes = [2, 384], strides = [1, 1]} : vector<16x384xf32> to vector<2x384xf32>
    %cst_25 = arith.constant dense<0.000000e+00> : vector<2x384xf32>
    %154 = tpu.matmul %152, %1, %cst_25 {dimension_numbers = #tpu.dot_dimension_numbers<[1], [0], [0], [1], [0, 0, 1, 1], [], []>} : vector<2x128xf32>, vector<128x384xf32>, vector<2x384xf32> -> vector<2x384xf32>
    %155 = vector.broadcast %3 : vector<1x384xf32> to vector<2x384xf32>
    %156 = arith.addf %154, %155 : vector<2x384xf32>
    %157 = vector.extract_strided_slice %153 {offsets = [0, 0], sizes = [2, 256], strides = [1, 1]} : vector<2x384xf32> to vector<2x256xf32>
    %158 = vector.extract_strided_slice %156 {offsets = [0, 0], sizes = [2, 256], strides = [1, 1]} : vector<2x384xf32> to vector<2x256xf32>
    %159 = arith.addf %157, %158 : vector<2x256xf32>
    %160 = arith.negf %159 : vector<2x256xf32>
    %161 = math.exp %160 : vector<2x256xf32>
    %cst_26 = arith.constant 1.000000e+00 : f32
    %162 = vector.broadcast %cst_26 : f32 to vector<2x256xf32>
    %163 = arith.addf %162, %161 : vector<2x256xf32>
    %164 = arith.divf %162, %163 : vector<2x256xf32>
    %165 = vector.extract_strided_slice %164 {offsets = [0, 0], sizes = [2, 128], strides = [1, 1]} : vector<2x256xf32> to vector<2x128xf32>
    %166 = vector.extract_strided_slice %164 {offsets = [0, 128], sizes = [2, 128], strides = [1, 1]} : vector<2x256xf32> to vector<2x128xf32>
    %167 = vector.extract_strided_slice %153 {offsets = [0, 256], sizes = [2, 128], strides = [1, 1]} : vector<2x384xf32> to vector<2x128xf32>
    %168 = vector.extract_strided_slice %156 {offsets = [0, 256], sizes = [2, 128], strides = [1, 1]} : vector<2x384xf32> to vector<2x128xf32>
    %169 = arith.mulf %165, %168 : vector<2x128xf32>
    %170 = arith.addf %167, %169 : vector<2x128xf32>
    %171 = math.tanh %170 : vector<2x128xf32>
    %cst_27 = arith.constant 1.000000e+00 : f32
    %172 = vector.broadcast %cst_27 : f32 to vector<2x128xf32>
    %173 = arith.subf %172, %166 : vector<2x128xf32>
    %174 = arith.mulf %173, %171 : vector<2x128xf32>
    %175 = arith.mulf %166, %152 : vector<2x128xf32>
    %176 = arith.addf %174, %175 : vector<2x128xf32>
    %177 = vector.extract_strided_slice %7 {offsets = [14, 0], sizes = [2, 384], strides = [1, 1]} : vector<16x384xf32> to vector<2x384xf32>
    %cst_28 = arith.constant dense<0.000000e+00> : vector<2x384xf32>
    %178 = tpu.matmul %176, %1, %cst_28 {dimension_numbers = #tpu.dot_dimension_numbers<[1], [0], [0], [1], [0, 0, 1, 1], [], []>} : vector<2x128xf32>, vector<128x384xf32>, vector<2x384xf32> -> vector<2x384xf32>
    %179 = vector.broadcast %3 : vector<1x384xf32> to vector<2x384xf32>
    %180 = arith.addf %178, %179 : vector<2x384xf32>
    %181 = vector.extract_strided_slice %177 {offsets = [0, 0], sizes = [2, 256], strides = [1, 1]} : vector<2x384xf32> to vector<2x256xf32>
    %182 = vector.extract_strided_slice %180 {offsets = [0, 0], sizes = [2, 256], strides = [1, 1]} : vector<2x384xf32> to vector<2x256xf32>
    %183 = arith.addf %181, %182 : vector<2x256xf32>
    %184 = arith.negf %183 : vector<2x256xf32>
    %185 = math.exp %184 : vector<2x256xf32>
    %cst_29 = arith.constant 1.000000e+00 : f32
    %186 = vector.broadcast %cst_29 : f32 to vector<2x256xf32>
    %187 = arith.addf %186, %185 : vector<2x256xf32>
    %188 = arith.divf %186, %187 : vector<2x256xf32>
    %189 = vector.extract_strided_slice %188 {offsets = [0, 0], sizes = [2, 128], strides = [1, 1]} : vector<2x256xf32> to vector<2x128xf32>
    %190 = vector.extract_strided_slice %188 {offsets = [0, 128], sizes = [2, 128], strides = [1, 1]} : vector<2x256xf32> to vector<2x128xf32>
    %191 = vector.extract_strided_slice %177 {offsets = [0, 256], sizes = [2, 128], strides = [1, 1]} : vector<2x384xf32> to vector<2x128xf32>
    %192 = vector.extract_strided_slice %180 {offsets = [0, 256], sizes = [2, 128], strides = [1, 1]} : vector<2x384xf32> to vector<2x128xf32>
    %193 = arith.mulf %189, %192 : vector<2x128xf32>
    %194 = arith.addf %191, %193 : vector<2x128xf32>
    %195 = math.tanh %194 : vector<2x128xf32>
    %cst_30 = arith.constant 1.000000e+00 : f32
    %196 = vector.broadcast %cst_30 : f32 to vector<2x128xf32>
    %197 = arith.subf %196, %190 : vector<2x128xf32>
    %198 = arith.mulf %197, %195 : vector<2x128xf32>
    %199 = arith.mulf %190, %176 : vector<2x128xf32>
    %200 = arith.addf %198, %199 : vector<2x128xf32>
    %c0_31 = arith.constant 0 : index
    %c0_32 = arith.constant 0 : index
    %201 = vector.load %arg2[%c0_31, %c0_32] : memref<216x32xf32, #tpu.memory_space<vmem>>, vector<64x32xf32>
    %c64 = arith.constant 64 : index
    %c0_33 = arith.constant 0 : index
    %202 = vector.load %arg2[%c64, %c0_33] : memref<216x32xf32, #tpu.memory_space<vmem>>, vector<128x32xf32>
    %c192 = arith.constant 192 : index
    %c0_34 = arith.constant 0 : index
    %203 = vector.load %arg2[%c192, %c0_34] : memref<216x32xf32, #tpu.memory_space<vmem>>, vector<1x32xf32>
    %c200 = arith.constant 200 : index
    %c0_35 = arith.constant 0 : index
    %204 = vector.load %arg2[%c200, %c0_35] : memref<216x32xf32, #tpu.memory_space<vmem>>, vector<1x32xf32>
    %c208 = arith.constant 208 : index
    %c0_36 = arith.constant 0 : index
    %205 = vector.load %arg2[%c208, %c0_36] : memref<216x32xf32, #tpu.memory_space<vmem>>, vector<1x32xf32>
    %cst_37 = arith.constant dense<0.000000e+00> : vector<2x32xf32>
    %206 = tpu.matmul %200, %202, %cst_37 {dimension_numbers = #tpu.dot_dimension_numbers<[1], [0], [0], [1], [0, 0, 1, 1], [], []>} : vector<2x128xf32>, vector<128x32xf32>, vector<2x32xf32> -> vector<2x32xf32>
    %207 = vector.broadcast %204 : vector<1x32xf32> to vector<2x32xf32>
    %208 = arith.addf %206, %207 : vector<2x32xf32>
    %cst_38 = arith.constant 0.000000e+00 : f32
    %209 = vector.broadcast %cst_38 : f32 to vector<2x32xf32>
    %210 = arith.cmpf ogt, %208, %209 : vector<2x32xf32>
    %cst_39 = arith.constant 0.00999999977 : f32
    %211 = vector.broadcast %cst_39 : f32 to vector<2x32xf32>
    %212 = arith.mulf %211, %208 : vector<2x32xf32>
    %213 = arith.select %210, %208, %212 : vector<2x32xi1>, vector<2x32xf32>
    %214 = vector.broadcast %205 : vector<1x32xf32> to vector<2x32xf32>
    %215 = arith.mulf %213, %214 : vector<2x32xf32>
    tpu.wait_dma2 semaphore(%arg7 : memref<!tpu.dma_semaphore, #tpu.memory_space<semaphore_mem>>) src(%arg4 : memref<32x64xf32, #tpu.memory_space<any>>) dst(%arg6 : memref<32x64xf32, #tpu.memory_space<vmem>>)
    %c0_40 = arith.constant 0 : index
    %c0_41 = arith.constant 0 : index
    %216 = vector.load %arg6[%c0_40, %c0_41] : memref<32x64xf32, #tpu.memory_space<vmem>>, vector<32x64xf32>
    %cst_42 = arith.constant dense<0.000000e+00> : vector<32x32xf32>
    %217 = tpu.matmul %216, %201, %cst_42 {dimension_numbers = #tpu.dot_dimension_numbers<[1], [0], [0], [1], [0, 0, 1, 1], [], []>} : vector<32x64xf32>, vector<64x32xf32>, vector<32x32xf32> -> vector<32x32xf32>
    %218 = vector.broadcast %203 : vector<1x32xf32> to vector<32x32xf32>
    %219 = arith.addf %217, %218 : vector<32x32xf32>
    %cst_43 = arith.constant 0.000000e+00 : f32
    %220 = vector.broadcast %cst_43 : f32 to vector<32x32xf32>
    %221 = arith.cmpf ogt, %219, %220 : vector<32x32xf32>
    %cst_44 = arith.constant 0.00999999977 : f32
    %222 = vector.broadcast %cst_44 : f32 to vector<32x32xf32>
    %223 = arith.mulf %222, %219 : vector<32x32xf32>
    %224 = arith.select %221, %219, %223 : vector<32x32xi1>, vector<32x32xf32>
    %225 = vector.shape_cast %224 : vector<32x32xf32> to vector<2x16x32xf32>
    %226 = vector.shape_cast %215 : vector<2x32xf32> to vector<2x1x32xf32>
    %227 = vector.broadcast %226 : vector<2x1x32xf32> to vector<2x16x32xf32>
    %228 = arith.mulf %225, %227 : vector<2x16x32xf32>
    %cst_45 = arith.constant dense<0.000000e+00> : vector<2x16xf32>
    %229 = vector.multi_reduction <add>, %228, %cst_45 [2] : vector<2x16x32xf32> to vector<2x16xf32>
    %c0_46 = arith.constant 0 : index
    %c0_47 = arith.constant 0 : index
    %230 = memref.load %arg3[%c0_46, %c0_47] : memref<1x1xf32, #tpu.memory_space<smem>>
    %231 = vector.broadcast %230 : f32 to vector<2x16xf32>
    %232 = arith.addf %229, %231 : vector<2x16xf32>
    %233 = arith.negf %232 : vector<2x16xf32>
    %234 = math.exp %233 : vector<2x16xf32>
    %cst_48 = arith.constant 1.000000e+00 : f32
    %235 = vector.broadcast %cst_48 : f32 to vector<2x16xf32>
    %236 = arith.addf %235, %234 : vector<2x16xf32>
    %237 = arith.divf %235, %236 : vector<2x16xf32>
    %cst_49 = arith.constant dense<0.000000e+00> : vector<2xf32>
    %238 = vector.multi_reduction <add>, %237, %cst_49 [1] : vector<2x16xf32> to vector<2xf32>
    %239 = vector.shape_cast %238 : vector<2xf32> to vector<2x1xf32>
    %c0_50 = arith.constant 0 : index
    %c0_51 = arith.constant 0 : index
    %240 = vector.load %arg5[%c0_50, %c0_51] : memref<2x1xf32, #tpu.memory_space<vmem>>, vector<2x1xf32>
    tpu.vector_store %arg5[%c0_50, %c0_51], %239 {strides = array<i32>} : memref<2x1xf32, #tpu.memory_space<vmem>>, vector<2x1xf32>,
    return
  }
}

</mosaic_0001>

<bundles_post_ra>
// kernel: soft_count_forward.1
= control target key start
LH: loop header
LB: loop body
LE: loop exit
PB: predicated region body
PF: predicated region fallthrough
CT: control target
= control target key end

     0   :  { %v4131_v8 = vmov 0.0   ;;  %s4125_s0 = inlined_call_operand.vmem [shape: f32[16,16], index: 0, kind: input, shape index: {}]   ;;  %s4126_s1 = inlined_call_operand.vmem [shape: f32[160,384], index: 1, kind: input, shape index: {}]   ;;  %s4127_s2 = inlined_call_operand.vmem [shape: f32[216,32], index: 2, kind: input, shape index: {}]   ;;  %s4128_s3 = inlined_call_operand.<no memory space> [shape: f32[1,1], index: 3, kind: input, shape index: {}]   ;;  %s4129_s4 = inlined_call_operand.vmem [shape: f32[32,64], index: 4, kind: input, shape index: {}]   ;;  %s4130_s5 = inlined_call_operand.vmem [shape: f32[2,1], index: 5, kind: output, shape index: {}]  }
   0x1   :  { %v2796_v0 = vld [vmem:[%s4129_s4] sm:$0xff]  ;;  %v2801_v1 = vld [vmem:[%s4129_s4 + $0x8] sm:$0xff]  ;;  %v2806_v2 = vld [vmem:[%s4129_s4 + $0x10] sm:$0xff]  ;;  %215 = vmatprep.mubr.f32.mxu1 %v4131_v8  ;;  %383 = vmatprep.mubr.f32.mxu0 %v4131_v8 }
   0x2   :  { %4167 = vst [vmem:[#allocation7_spill] sm:$0xff] %v2796_v0  ;;  %4168 = vst [vmem:[#allocation8_spill] sm:$0xff] %v2801_v1  ;;  %v2811_v3 = vld [vmem:[%s4129_s4 + $0x18] sm:$0xff]  ;;  %v2816_v4 = vld [vmem:[%s4126_s1 + $0x1a0] sm:$0xff] }
   0x3   :  { %4169 = vst [vmem:[#allocation9_spill] sm:$0xff] %v2806_v2  ;;  %4170 = vst [vmem:[#allocation10_spill] sm:$0xff] %v2811_v3  ;;  %v2821_v5 = vld [vmem:[%s4126_s1 + $0x198] sm:$0xff]  ;;  %v2826_v6 = vld [vmem:[%s4126_s1 + $0x188] sm:$0xff]  ;;  %319 = vmatprep.subr.mxu0 %v2816_v4 }
   0x4   :  { %4171 = vst [vmem:[#allocation11_spill] sm:$0xff] %v2816_v4  ;;  %v2832_v7 = vld [vmem:[%s4126_s1 + $0x180] sm:$0xff]  ;;  %320 = vmatpush1.msra.mxu0 %v2821_v5  ;;  %v2839_v9 = vld [vmem:[%s4126_s1 + $0x170] sm:$0xff]  ;;  %v2846_v10 = vld [vmem:[%s4126_s1 + $0x168] sm:$0xff] }
   0x5   :  { %321 = vmatprep.subr.mxu0 %v2826_v6  ;;  %v2852_v11 = vld [vmem:[%s4126_s1 + $0x158] sm:$0xff]  ;;  %v2858_v12 = vld [vmem:[%s4126_s1 + $0x150] sm:$0xff]  ;;  %v2864_v13 = vld [vmem:[%s4126_s1 + $0x140] sm:$0xff] }
   0x6   :  { %322 = vmatpush1.msra.mxu0 %v2832_v7  ;;  %v2870_v14 = vld [vmem:[%s4126_s1 + $0x138] sm:$0xff] }
   0x7   :  { %323 = vmatprep.subr.mxu0 %v2839_v9 }
   0x8   :  { %324 = vmatpush1.msra.mxu0 %v2846_v10 }
   0x9   :  { %325 = vmatprep.subr.mxu0 %v2852_v11 }
   0xa   :  { %67 = vsyncadd [#allocation3], 512  ;;  %v72_v15 = vld [vmem:[%s4126_s1 + $0x20] sm:$0xff]  ;;  %326 = vmatpush1.msra.mxu0 %v2858_v12  ;;  %v2879_v16 = vld [vmem:[%s4126_s1 + $0x128] sm:$0xff]  ;;  %vm144_vm0 = vcmask 130048   ;;  %vm2761_vm1 = vmmov 0   ;;  %v4133_v61 = vlaneseq }
   0xb   :  { %179 = vmatprep.subr.mxu1 %v72_v15  ;;  %v71_v17 = vld [vmem:[%s4126_s1 + $0x18] sm:$0xff]  ;;  %v69_v18 = vld [vmem:[%s4126_s1 + $0x8] sm:$0xff]  ;;  %327 = vmatprep.subr.mxu0 %v2864_v13  ;;  %v2891_v19 = vld [vmem:[%s4126_s1 + $0x120] sm:$0xff]  ;;  %vm1821_vm3 = vcmask 523264  }
   0xc   :  { %180 = vmatpush1.msra.mxu1 %v71_v17  ;;  %v68_v20 = vld [vmem:[%s4126_s1] sm:$0xff]  ;;  %328 = vmatpush1.msra.mxu0 %v2870_v14  ;;  %v2900_v21 = vld [vmem:[%s4126_s1 + $0x110] sm:$0xff]  ;;  %v73_v23 = vld [vmem:[%s4126_s1 + $0x28] sm:$0xff]  ;;  %v3222_v62 = vshrl.u32 %v4133_v61, 7 }
   0xd   :  { %181 = vmatprep.subr.mxu1 %v69_v18  ;;  %v126_v22 = vld [vmem:[%s4125_s0] sm:$0xff]  ;;  %329 = vmatprep.subr.mxu0 %v2879_v16  ;;  %v2912_v24 = vld [vmem:[%s4126_s1 + $0x108] sm:$0xff]  ;;  %v2918_v25 = vld [vmem:[%s4126_s1 + $0xf8] sm:$0xff] }
   0xe   :  { %182 = vmatpush1.msra.mxu1 %v68_v20  ;;  %330 = vmatpush1.msra.mxu0 %v2891_v19  ;;  %v2925_v26 = vld [vmem:[%s4126_s1 + $0xf0] sm:$0xff]  ;;  %v127_v27 = vld [vmem:[%s4125_s0 + $0x8] sm:$0xff]  ;;  %v2934_v28 = vld [vmem:[%s4126_s1 + $0xe0] sm:$0xff]  ;;  %4179 = vst [vmem:[#allocation19_spill] sm:$0xff] %v3222_v62  ;;  %v3225_v63 = vsub.s32 0, %v3222_v62  ;;  %v135_v18 = vsub.s32 1, %v3222_v62 }
   0xf   :  { %2066 = vmatmul.mubr.msk.f32.vlgmr.msra.gmra.mxu1 %vm144_vm0, %v126_v22  ;;  %331 = vmatprep.subr.mxu0 %v2900_v21  ;;  %v70_v29 = vld [vmem:[%s4126_s1 + $0x10] sm:$0xff]  ;;  %v2943_v30 = vld [vmem:[%s4126_s1 + $0xd8] sm:$0xff]  ;;  %v2950_v31 = vld [vmem:[%s4126_s1 + $0xc8] sm:$0xff] }
  0x10   :  { %2267 = vmatprep.subr.mxu1 %v73_v23  ;;  %332 = vmatpush1.msra.mxu0 %v2912_v24  ;;  %v2957_v32 = vld [vmem:[%s4126_s1 + $0xc0] sm:$0xff]  ;;  %v2963_v33 = vld [vmem:[%s4126_s1 + $0xb0] sm:$0xff]  ;;  %v2969_v34 = vld [vmem:[%s4126_s1 + $0xa8] sm:$0xff]  ;;  %4180 = vst [vmem:[#allocation20_spill] sm:$0xff] %v3225_v63 }
  0x11   :  { %2268 = vmatpush3.msra.mxu1 %v73_v23  ;;  %333 = vmatprep.subr.mxu0 %v2918_v25  ;;  %v2975_v35 = vld [vmem:[%s4126_s1 + $0x1a8] sm:$0xff]  ;;  %v2981_v36 = vld [vmem:[%s4126_s1 + $0x98] sm:$0xff]  ;;  %v2988_v37 = vld [vmem:[%s4126_s1 + $0x90] sm:$0xff] }
  0x12   :  { %221 = vmatprep.mubr.f32.mxu1 %v4131_v8  ;;  %334 = vmatpush1.msra.mxu0 %v2925_v26  ;;  %v2994_v38 = vld [vmem:[%s4126_s1 + $0x190] sm:$0xff]  ;;  %v3000_v39 = vld [vmem:[%s4126_s1 + $0x80] sm:$0xff]  ;;  %v3007_v40 = vld [vmem:[%s4126_s1 + $0x78] sm:$0xff] }
  0x13   :  { %2067 = vmatmul.mubr.msk.f32.gmra.mxu1 %vm144_vm0, %v127_v27  ;;  %335 = vmatprep.subr.mxu0 %v2934_v28  ;;  %v3013_v41 = vld [vmem:[%s4126_s1 + $0x178] sm:$0xff]  ;;  %v3019_v42 = vld [vmem:[%s4126_s1 + $0x68] sm:$0xff]  ;;  %v3026_v43 = vld [vmem:[%s4126_s1 + $0x60] sm:$0xff] }
  0x14   :  { %2269 = vmatprep.subr.mxu1 %v70_v29  ;;  %336 = vmatpush1.msra.mxu0 %v2943_v30  ;;  %v3032_v44 = vld [vmem:[%s4126_s1 + $0x160] sm:$0xff]  ;;  %v3038_v45 = vld [vmem:[%s4126_s1 + $0x50] sm:$0xff]  ;;  %v3045_v46 = vld [vmem:[%s4126_s1 + $0x48] sm:$0xff] }
  0x15   :  { %2270 = vmatpush3.msra.mxu1 %v70_v29  ;;  %337 = vmatprep.subr.mxu0 %v2950_v31  ;;  %4172 = vst [vmem:[#allocation12_spill] sm:$0xff] %v3038_v45  ;;  %4173 = vst [vmem:[#allocation13_spill] sm:$0xff] %v3045_v46  ;;  %v3051_v47 = vld [vmem:[%s4126_s1 + $0x148] sm:$0xff]  ;;  %v3057_v48 = vld [vmem:[%s4126_s1 + $0x38] sm:$0xff] }
  0x16   :  { %2271 = vmatprep.mubr.msk.f32.mxu1 %vm144_vm0, %v126_v22  ;;  %338 = vmatpush1.msra.mxu0 %v2957_v32  ;;  %4174 = vst [vmem:[#allocation14_spill] sm:$0xff] %v3057_v48  ;;  %v3064_v49 = vld [vmem:[%s4126_s1 + $0x30] sm:$0xff]  ;;  %v3079_v51 = vld [vmem:[%s4126_s1 + $0x118] sm:$0xff]  ;;  %v3088_v52 = vld [vmem:[%s4126_s1 + $0x100] sm:$0xff]  ;;  %v139_v22 = vsub.s32 2, %v3222_v62 }
  0x17   :  { %2274 = vmatprep.subr.mxu1 %v4131_v8  ;;  %339 = vmatprep.subr.mxu0 %v2963_v33  ;;  %4175 = vst [vmem:[#allocation15_spill] sm:$0xff] %v3064_v49  ;;  %v3070_v50 = vld [vmem:[%s4126_s1 + $0x130] sm:$0xff]  ;;  %v3097_v53 = vld [vmem:[%s4126_s1 + $0xe8] sm:$0xff]  ;;  %v3115_v55 = vld [vmem:[%s4126_s1 + $0xb8] sm:$0xff] }
  0x18   :  { %2272 = vmatmul.mubr.msk.f32.vlgmr.msra.gmra.mxu1 %vm144_vm0, %v127_v27  ;;  %340 = vmatpush1.msra.mxu0 %v2969_v34  ;;  %v3106_v54 = vld [vmem:[%s4126_s1 + $0xd0] sm:$0xff]  ;;  %v3124_v56 = vld [vmem:[%s4126_s1 + $0xa0] sm:$0xff]  ;;  %v3133_v57 = vld [vmem:[%s4126_s1 + $0x88] sm:$0xff] }
  0x19   :  { %2275 = vmatpush3.msra.mxu1 %v2975_v35  ;;  %341 = vmatprep.subr.mxu0 %v2981_v36  ;;  %v3142_v58 = vld [vmem:[%s4126_s1 + $0x70] sm:$0xff]  ;;  %v3151_v59 = vld [vmem:[%s4126_s1 + $0x58] sm:$0xff]  ;;  %v3160_v60 = vld [vmem:[%s4126_s1 + $0x40] sm:$0xff] }
  0x1a   :  { %2276 = vmatprep.subr.mxu1 %v4131_v8  ;;  %342 = vmatpush1.msra.mxu0 %v2988_v37  ;;  %4176 = vst [vmem:[#allocation16_spill] sm:$0xff] %v3142_v58  ;;  %4177 = vst [vmem:[#allocation17_spill] sm:$0xff] %v3151_v59  ;;  %v2064_v15 = vld [vmem:[%s4126_s1 + $0x1b0] ss:$8 sm:$0x7] }
  0x1b   :  { %2277 = vmatpush3.msra.mxu1 %v2994_v38  ;;  %343 = vmatprep.subr.mxu0 %v3000_v39  ;;  %4178 = vst [vmem:[#allocation18_spill] sm:$0xff] %v3160_v60  ;;  %v132_v23 = vrot.slane %v2064_v15, %v3225_v63  ;;  %v136_v29 = vrot.slane %v2064_v15, %v135_v18 }
  0x1c   :  { %2278 = vmatprep.subr.mxu1 %v4131_v8  ;;  %344 = vmatpush1.msra.mxu0 %v3007_v40  ;;  %v140_v3 = vrot.slane %v2064_v15, %v139_v22 }
  0x1d   :  { %2279 = vmatpush3.msra.mxu1 %v3013_v41  ;;  %345 = vmatprep.subr.mxu0 %v3019_v42 }
  0x1e   :  { %2280 = vmatprep.subr.mxu1 %v4131_v8  ;;  %346 = vmatpush1.msra.mxu0 %v3026_v43 }
  0x1f   :  { %2281 = vmatpush3.msra.mxu1 %v3032_v44  ;;  %347 = vmatprep.subr.mxu0 %v3038_v45 }
  0x20   :  { %2282 = vmatprep.subr.mxu1 %v4131_v8  ;;  %348 = vmatpush1.msra.mxu0 %v3045_v46 }
  0x21   :  { %2283 = vmatpush3.msra.mxu1 %v3051_v47  ;;  %349 = vmatprep.subr.mxu0 %v3057_v48 }
  0x22   :  { %2284 = vmatprep.subr.mxu1 %v4131_v8  ;;  %350 = vmatpush1.msra.mxu0 %v3064_v49 }
  0x23   :  { %2285 = vmatpush3.msra.mxu1 %v3070_v50  ;;  %384 = vmatmul.mubr.f32.vlgmr.msra.gmra.mxu0 %v4131_v8 }
  0x24   :  { %2286 = vmatprep.subr.mxu1 %v4131_v8  ;;  %2306 = vmatprep.mubr.msk.f32.mxu1 %vm2761_vm1, %v4131_v8 }
  0x25   :  { %2287 = vmatpush3.msra.mxu1 %v3079_v51  ;;  %481 = vmatprep.subr.mxu0 %v2816_v4 }
  0x26   :  { %2288 = vmatprep.subr.mxu1 %v4131_v8  ;;  %482 = vmatpush1.msra.mxu0 %v2821_v5 }
  0x27   :  { %2289 = vmatpush3.msra.mxu1 %v3088_v52  ;;  %483 = vmatprep.subr.mxu0 %v2826_v6 }
  0x28   :  { %2290 = vmatprep.subr.mxu1 %v4131_v8  ;;  %484 = vmatpush1.msra.mxu0 %v2832_v7 }
  0x29   :  { %2291 = vmatpush3.msra.mxu1 %v3097_v53  ;;  %485 = vmatprep.subr.mxu0 %v2839_v9 }
  0x2a   :  { %2292 = vmatprep.subr.mxu1 %v4131_v8  ;;  %486 = vmatpush1.msra.mxu0 %v2846_v10 }
  0x2b   :  { %2293 = vmatpush3.msra.mxu1 %v3106_v54  ;;  %487 = vmatprep.subr.mxu0 %v2852_v11 }
  0x2c   :  { %2294 = vmatprep.subr.mxu1 %v4131_v8  ;;  %488 = vmatpush1.msra.mxu0 %v2858_v12 }
  0x2d   :  { %2295 = vmatpush3.msra.mxu1 %v3115_v55  ;;  %489 = vmatprep.subr.mxu0 %v2864_v13 }
  0x2e   :  { %2296 = vmatprep.subr.mxu1 %v4131_v8  ;;  %490 = vmatpush1.msra.mxu0 %v2870_v14 }
  0x2f   :  { %2297 = vmatpush3.msra.mxu1 %v3124_v56  ;;  %491 = vmatprep.subr.mxu0 %v2879_v16 }
  0x30   :  { %2298 = vmatprep.subr.mxu1 %v4131_v8  ;;  %492 = vmatpush1.msra.mxu0 %v2891_v19 }
  0x31   :  { %2299 = vmatpush3.msra.mxu1 %v3133_v57  ;;  %493 = vmatprep.subr.mxu0 %v2900_v21 }
  0x32   :  { %2300 = vmatprep.subr.mxu1 %v4131_v8  ;;  %494 = vmatpush1.msra.mxu0 %v2912_v24 }
  0x33   :  { %2301 = vmatpush3.msra.mxu1 %v3142_v58  ;;  %495 = vmatprep.subr.mxu0 %v2918_v25 }
  0x34   :  { %2302 = vmatprep.subr.mxu1 %v4131_v8  ;;  %496 = vmatpush1.msra.mxu0 %v2925_v26 }
  0x35   :  { %2303 = vmatpush3.msra.mxu1 %v3151_v59  ;;  %497 = vmatprep.subr.mxu0 %v2934_v28 }
  0x36   :  { %2304 = vmatprep.subr.mxu1 %v4131_v8  ;;  %498 = vmatpush1.msra.mxu0 %v2943_v30 }
  0x37   :  { %2305 = vmatpush3.msra.mxu1 %v3160_v60  ;;  %499 = vmatprep.subr.mxu0 %v2950_v31 }
  0x38   :  { %2307 = vmatmul.mubr.f32.vlgmr.msra.gmra.mxu1 %v4131_v8  ;;  %2309 = vmatprep.subr.mxu1 %v4131_v8 }
  0x39   :  { %2310 = vmatpush3.msra.mxu1 %v2975_v35  ;;  %500 = vmatpush1.msra.mxu0 %v2957_v32 }
  0x3a   :  { %2311 = vmatprep.subr.mxu1 %v4131_v8  ;;  %501 = vmatprep.subr.mxu0 %v2963_v33 }
  0x3b   :  { %2312 = vmatpush3.msra.mxu1 %v2994_v38  ;;  %502 = vmatpush1.msra.mxu0 %v2969_v34 }
  0x3c   :  { %2313 = vmatprep.subr.mxu1 %v4131_v8  ;;  %503 = vmatprep.subr.mxu0 %v2981_v36 }
  0x3d   :  { %2314 = vmatpush3.msra.mxu1 %v3013_v41  ;;  %504 = vmatpush1.msra.mxu0 %v2988_v37 }
  0x3e   :  { %2315 = vmatprep.subr.mxu1 %v4131_v8  ;;  %505 = vmatprep.subr.mxu0 %v3000_v39 }
  0x3f   :  { %2316 = vmatpush3.msra.mxu1 %v3032_v44  ;;  %506 = vmatpush1.msra.mxu0 %v3007_v40 }
  0x40   :  { %2317 = vmatprep.subr.mxu1 %v4131_v8  ;;  %507 = vmatprep.subr.mxu0 %v3019_v42 }
  0x41   :  { %2318 = vmatpush3.msra.mxu1 %v3051_v47  ;;  %508 = vmatpush1.msra.mxu0 %v3026_v43 }
  0x42   :  { %2319 = vmatprep.subr.mxu1 %v4131_v8  ;;  %509 = vmatprep.subr.mxu0 %v3038_v45 }
  0x43   :  { %2320 = vmatpush3.msra.mxu1 %v3070_v50  ;;  %510 = vmatpush1.msra.mxu0 %v3045_v46 }
  0x44   :  { %2321 = vmatprep.subr.mxu1 %v4131_v8  ;;  %511 = vmatprep.subr.mxu0 %v3057_v48 }
  0x45   :  { %2322 = vmatpush3.msra.mxu1 %v3079_v51  ;;  %512 = vmatpush1.msra.mxu0 %v3064_v49 }
  0x46   :  { %2323 = vmatprep.subr.mxu1 %v4131_v8  ;;  %545 = vmatprep.mubr.f32.mxu0 %v4131_v8 }
  0x47   :  { %2324 = vmatpush3.msra.mxu1 %v3088_v52  ;;  %2341 = vmatprep.mubr.msk.f32.mxu1 %vm2761_vm1, %v4131_v8 }
  0x48   :  { %2325 = vmatprep.subr.mxu1 %v4131_v8  ;;  %658 = vmatprep.subr.mxu0 %v2816_v4  ;;  %v2065_v4 = vld [vmem:[%s4126_s1 + $0x1c8] ss:$8 sm:$0x7] }
  0x49   :  { %2326 = vmatpush3.msra.mxu1 %v3097_v53  ;;  %v3247_v48 = vrot.slane %v2065_v4, %v135_v18 }
  0x4a   :  { %2327 = vmatprep.subr.mxu1 %v4131_v8 }
  0x4b   :  { %2328 = vmatpush3.msra.mxu1 %v3106_v54 }
  0x4c   :  { %2329 = vmatprep.subr.mxu1 %v4131_v8 }
  0x4d   :  { %2330 = vmatpush3.msra.mxu1 %v3115_v55 }
  0x4e   :  { %2331 = vmatprep.subr.mxu1 %v4131_v8 }
  0x4f   :  { %2332 = vmatpush3.msra.mxu1 %v3124_v56 }
  0x50   :  { %2333 = vmatprep.subr.mxu1 %v4131_v8 }
  0x51   :  { %2334 = vmatpush3.msra.mxu1 %v3133_v57 }
  0x52   :  { %2335 = vmatprep.subr.mxu1 %v4131_v8 }
  0x53   :  { %2336 = vmatpush3.msra.mxu1 %v3142_v58 }
  0x54   :  { %2337 = vmatprep.subr.mxu1 %v4131_v8 }
  0x55   :  { %2338 = vmatpush3.msra.mxu1 %v3151_v59 }
  0x56   :  { %2339 = vmatprep.subr.mxu1 %v4131_v8 }
  0x57   :  { %2340 = vmatpush3.msra.mxu1 %v3160_v60  ;;  %v3243_v60 = vrot.slane %v2065_v4, %v3225_v63 }
  0x58   :  { %2344 = vmatprep.subr.mxu1 %v4131_v8 }
  0x59   :  { %4184 = vst [vmem:[#allocation24_spill] sm:$0xff] %v3243_v60 }
  0xcf   :  { %v217_v17 = vpop.f32.mrf.mxu1 }
  0xd0   :  { %v3245_v49 = vadd.f32 %v217_v17, %v132_v23 }
  0xd1   :  { %v219_v20 = vpop.f32.mrf.mxu1 }
  0xd3   :  { %v223_v27 = vpop.f32.mrf.mxu1 }
  0xd4   :  { %v3233_v8 = vadd.f32 %v223_v27, %v132_v23 }
  0xd5   :  { %v225_v61 = vpop.f32.mrf.mxu1 }
  0xd6   :  { %4181 = vst [vmem:[#allocation21_spill] sm:$0xff] %v3233_v8  ;;  %v3235_v2 = vadd.f32 %v225_v61, %v136_v29 }
  0xd8   :  { %4182 = vst [vmem:[#allocation22_spill] sm:$0xff] %v3235_v2  ;;  %v2273_v1 = vpop.f32.mrf.mxu1 }
  0xd9   :  { %v3237_v0 = vadd.f32 %v2273_v1, %v140_v3 }
  0xda   :  { %v294_v59 = vpop.f32.mrf.mxu1 }
  0xdb   :  { %4183 = vst [vmem:[#allocation23_spill] sm:$0xff] %v3237_v0  ;;  %v3252_v0 = vadd.f32 %v219_v20, %v136_v29  ;;  %v3258_v20 = vadd.f32 %v294_v59, %v140_v3  ;;  %v4185_v3 = vmov 0.0   ;;  %v4187_v59 = vld [vmem:[#allocation17_spill] sm:$0xff] }
  0xe3   :  { %v385_v62 = vpop.f32.mrf.mxu0 }
  0xe4   :  { %v386_v27 = vadd.f32 %v385_v62, %v3243_v60  ;;  %v3255_v62 = vrot.slane %v2065_v4, %v139_v22  ;;  %v4186_v4 = vld [vmem:[#allocation13_spill] sm:$0xff]  ;;  %v4189_v22 = vld [vmem:[#allocation15_spill] sm:$0xff] }
  0xe5   :  { %v387_v15 = vpop.f32.mrf.mxu0 }
  0xe6   :  { %v460_v61 = vadd.f32 %v386_v27, %v3245_v49  ;;  %v388_v1 = vadd.f32 %v387_v15, %v3247_v48 }
  0xe8   :  { %v2070_v2 = vmul.f32 -1.442695, %v460_v61  ;;  %v461_v8 = vadd.f32 %v388_v1, %v3252_v0 }
  0xea   :  { %2614 = vpow2.f32 %v2070_v2  ;;  %v2071_v63 = vmul.f32 -1.442695, %v461_v8 }
  0xec   :  { %2616 = vpow2.f32 %v2071_v63 }
  0xf7   :  { %v2615_v17 = vpop.eup %2614 }
  0xf8   :  { %v456_v23 = vpop.f32.mrf.mxu1  ;;  %v468_v18 = vadd.f32 1.0, %v2615_v17 }
  0xf9   :  { %v2617_v60 = vpop.eup %2616  ;;  %v457_v61 = vadd.f32 %v456_v23, %v3255_v62  ;;  %v4190_v23 = vld [vmem:[#allocation18_spill] sm:$0xff] }
  0xfa   :  { %v2308_v46 = vpop.f32.mrf.mxu1  ;;  %2618 = vrcp.f32 %v468_v18  ;;  %v469_v27 = vadd.f32 1.0, %v2617_v60  ;;  %v4188_v60 = vld [vmem:[#allocation14_spill] sm:$0xff] }
  0xfc   :  { %2620 = vrcp.f32 %v469_v27  ;;  %v4191_v27 = vld [vmem:[#allocation11_spill] sm:$0xff] }
 0x107   :  { %v2619_v15 = vpop.eup %2618 }
 0x108   :  { %v474_v2 = vmul.f32 %v2619_v15, %v457_v61 }
 0x109   :  { %v2621_v63 = vpop.eup %2620 }
 0x10a   :  { %v475_v8 = vadd.f32 %v474_v2, %v3258_v20  ;;  %v477_v29 = vsub.f32 1.0, %v2621_v63  ;;  %v479_v46 = vmul.f32 0.0, %v2621_v63  ;;  %v4192_v2 = vld [vmem:[#allocation24_spill] sm:$0xff] }
 0x10c   :  { %2622 = vtanh.f32 %v475_v8 }
 0x119   :  { %v2623_v1 = vpop.eup %2622 }
 0x11a   :  { %v478_v17 = vmul.f32 %v2623_v1, %v477_v29 }
 0x11c   :  { %v3261_v18 = vadd.f32 %v479_v46, %v478_v17 }
 0x11e   :  { %546 = vmatmul.mubr.f32.vlgmr.msra.gmra.mxu0 %v3261_v18  ;;  %2342 = vmatmul.mubr.f32.vlgmr.msra.gmra.mxu1 %v3261_v18 }
 0x11f   :  { %659 = vmatpush1.msra.mxu0 %v2821_v5  ;;  %2345 = vmatpush3.msra.mxu1 %v2975_v35 }
 0x120   :  { %660 = vmatprep.subr.mxu0 %v2826_v6  ;;  %2346 = vmatprep.subr.mxu1 %v4185_v3 }
 0x121   :  { %661 = vmatpush1.msra.mxu0 %v2832_v7  ;;  %2347 = vmatpush3.msra.mxu1 %v2994_v38 }
 0x122   :  { %662 = vmatprep.subr.mxu0 %v2839_v9  ;;  %2348 = vmatprep.subr.mxu1 %v4185_v3 }
 0x123   :  { %663 = vmatpush1.msra.mxu0 %v2846_v10  ;;  %2349 = vmatpush3.msra.mxu1 %v3013_v41 }
 0x124   :  { %664 = vmatprep.subr.mxu0 %v2852_v11  ;;  %2350 = vmatprep.subr.mxu1 %v4185_v3 }
 0x125   :  { %665 = vmatpush1.msra.mxu0 %v2858_v12  ;;  %2351 = vmatpush3.msra.mxu1 %v3032_v44 }
 0x126   :  { %666 = vmatprep.subr.mxu0 %v2864_v13  ;;  %2352 = vmatprep.subr.mxu1 %v4185_v3 }
 0x127   :  { %667 = vmatpush1.msra.mxu0 %v2870_v14  ;;  %2353 = vmatpush3.msra.mxu1 %v3051_v47 }
 0x128   :  { %668 = vmatprep.subr.mxu0 %v2879_v16  ;;  %2354 = vmatprep.subr.mxu1 %v4185_v3 }
 0x129   :  { %669 = vmatpush1.msra.mxu0 %v2891_v19  ;;  %2355 = vmatpush3.msra.mxu1 %v3070_v50 }
 0x12a   :  { %670 = vmatprep.subr.mxu0 %v2900_v21  ;;  %2356 = vmatprep.subr.mxu1 %v4185_v3 }
 0x12b   :  { %671 = vmatpush1.msra.mxu0 %v2912_v24  ;;  %2357 = vmatpush3.msra.mxu1 %v3079_v51 }
 0x12c   :  { %672 = vmatprep.subr.mxu0 %v2918_v25  ;;  %2358 = vmatprep.subr.mxu1 %v4185_v3 }
 0x12d   :  { %673 = vmatpush1.msra.mxu0 %v2925_v26  ;;  %2359 = vmatpush3.msra.mxu1 %v3088_v52 }
 0x12e   :  { %674 = vmatprep.subr.mxu0 %v2934_v28  ;;  %2360 = vmatprep.subr.mxu1 %v4185_v3 }
 0x12f   :  { %675 = vmatpush1.msra.mxu0 %v2943_v30  ;;  %2361 = vmatpush3.msra.mxu1 %v3097_v53 }
 0x130   :  { %676 = vmatprep.subr.mxu0 %v2950_v31  ;;  %2362 = vmatprep.subr.mxu1 %v4185_v3 }
 0x131   :  { %677 = vmatpush1.msra.mxu0 %v2957_v32  ;;  %2363 = vmatpush3.msra.mxu1 %v3106_v54 }
 0x132   :  { %678 = vmatprep.subr.mxu0 %v2963_v33  ;;  %2364 = vmatprep.subr.mxu1 %v4185_v3 }
 0x133   :  { %679 = vmatpush1.msra.mxu0 %v2969_v34  ;;  %2365 = vmatpush3.msra.mxu1 %v3115_v55 }
 0x134   :  { %680 = vmatprep.subr.mxu0 %v2981_v36  ;;  %2366 = vmatprep.subr.mxu1 %v4185_v3 }
 0x135   :  { %681 = vmatpush1.msra.mxu0 %v2988_v37  ;;  %2367 = vmatpush3.msra.mxu1 %v3124_v56 }
 0x136   :  { %682 = vmatprep.subr.mxu0 %v3000_v39  ;;  %2368 = vmatprep.subr.mxu1 %v4185_v3 }
 0x137   :  { %683 = vmatpush1.msra.mxu0 %v3007_v40  ;;  %2369 = vmatpush3.msra.mxu1 %v3133_v57 }
 0x138   :  { %684 = vmatprep.subr.mxu0 %v3019_v42  ;;  %2370 = vmatprep.subr.mxu1 %v4185_v3 }
 0x139   :  { %685 = vmatpush1.msra.mxu0 %v3026_v43  ;;  %2371 = vmatpush3.msra.mxu1 %v3142_v58 }
 0x13a   :  { %686 = vmatprep.subr.mxu0 %v3038_v45  ;;  %2372 = vmatprep.subr.mxu1 %v4185_v3 }
 0x13b   :  { %687 = vmatpush1.msra.mxu0 %v4186_v4  ;;  %2373 = vmatpush3.msra.mxu1 %v4187_v59 }
 0x13c   :  { %688 = vmatprep.subr.mxu0 %v4188_v60  ;;  %2374 = vmatprep.subr.mxu1 %v4185_v3 }
 0x13d   :  { %689 = vmatpush1.msra.mxu0 %v4189_v22  ;;  %722 = vmatprep.mubr.f32.mxu0 %v4185_v3 }
 0x13e   :  { %2375 = vmatpush3.msra.mxu1 %v4190_v23  ;;  %2376 = vmatprep.mubr.msk.f32.mxu1 %vm2761_vm1, %v4185_v3 }
 0x13f   :  { %834 = vmatprep.subr.mxu0 %v4191_v27  ;;  %2379 = vmatprep.subr.mxu1 %v4185_v3 }
 0x1de   :  { %v547_v61 = vpop.f32.mrf.mxu0  ;;  %v618_v15 = vpop.f32.mrf.mxu1 }
 0x1df   :  { %v548_v8 = vadd.f32 %v547_v61, %v4192_v2  ;;  %v619_v61 = vadd.f32 %v618_v15, %v3255_v62  ;;  %v4196_v15 = vld [vmem:[#allocation17_spill] sm:$0xff] }
 0x1e0   :  { %v549_v63 = vpop.f32.mrf.mxu0  ;;  %v2343_v29 = vpop.f32.mrf.mxu1 }
 0x1e1   :  { %v624_v1 = vrot.slane %v548_v8, 6  ;;  %v550_v17 = vadd.f32 %v549_v63, %v3247_v48  ;;  %v643_v29 = vrot.slane %v619_v61, 6  ;;  %v4199_v61 = vld [vmem:[#allocation18_spill] sm:$0xff] }
 0x1e3   :  { %v628_v46 = vadd.f32 %v624_v1, %v3245_v49  ;;  %v625_v23 = vrot.slane %v550_v17, 6 }
 0x1e5   :  { %v2072_v22 = vmul.f32 -1.442695, %v628_v46  ;;  %v629_v60 = vadd.f32 %v625_v23, %v3252_v0  ;;  %v4198_v46 = vld [vmem:[#allocation15_spill] sm:$0xff] }
 0x1e7   :  { %2624 = vpow2.f32 %v2072_v22  ;;  %v2073_v59 = vmul.f32 -1.442695, %v629_v60  ;;  %v651_v22 = vrot.slane %v3261_v18, 6  ;;  %v4195_v18 = vld [vmem:[#allocation13_spill] sm:$0xff] }
 0x1e9   :  { %2626 = vpow2.f32 %v2073_v59 }
 0x1f4   :  { %v2625_v27 = vpop.eup %2624 }
 0x1f5   :  { %v636_v4 = vadd.f32 1.0, %v2625_v27 }
 0x1f6   :  { %v2627_v45 = vpop.eup %2626 }
 0x1f7   :  { %2628 = vrcp.f32 %v636_v4  ;;  %v637_v2 = vadd.f32 1.0, %v2627_v45  ;;  %v4193_v45 = vld [vmem:[#allocation16_spill] sm:$0xff] }
 0x1f9   :  { %2630 = vrcp.f32 %v637_v2  ;;  %v4197_v2 = vld [vmem:[#allocation14_spill] sm:$0xff] }
 0x204   :  { %v2629_v8 = vpop.eup %2628 }
 0x205   :  { %v645_v58 = vmul.f32 %v2629_v8, %v643_v29  ;;  %v4200_v29 = vld [vmem:[#allocation11_spill] sm:$0xff] }
 0x206   :  { %v2631_v1 = vpop.eup %2630 }
 0x207   :  { %v646_v63 = vadd.f32 %v645_v58, %v3258_v20  ;;  %v648_v23 = vsub.f32 1.0, %v2631_v1  ;;  %v653_v17 = vmul.f32 %v2631_v1, %v651_v22  ;;  %v4194_v58 = vld [vmem:[#allocation12_spill] sm:$0xff] }
 0x208   :  { %v4201_v1 = vld [vmem:[#allocation24_spill] sm:$0xff] }
 0x209   :  { %2632 = vtanh.f32 %v646_v63 }
 0x216   :  { %v2633_v60 = vpop.eup %2632 }
 0x217   :  { %v649_v59 = vmul.f32 %v2633_v60, %v648_v23 }
 0x219   :  { %v3339_v27 = vadd.f32 %v653_v17, %v649_v59 }
 0x21b   :  { %v656_v4 = vrot.slane %v3339_v27, 2 }
 0x21d   :  { %723 = vmatmul.mubr.f32.vlgmr.msra.gmra.mxu0 %v656_v4  ;;  %2377 = vmatmul.mubr.f32.vlgmr.msra.gmra.mxu1 %v656_v4 }
 0x21e   :  { %835 = vmatpush1.msra.mxu0 %v2821_v5  ;;  %2380 = vmatpush3.msra.mxu1 %v2975_v35 }
 0x21f   :  { %836 = vmatprep.subr.mxu0 %v2826_v6  ;;  %2381 = vmatprep.subr.mxu1 %v4185_v3 }
 0x220   :  { %837 = vmatpush1.msra.mxu0 %v2832_v7  ;;  %2382 = vmatpush3.msra.mxu1 %v2994_v38 }
 0x221   :  { %838 = vmatprep.subr.mxu0 %v2839_v9  ;;  %2383 = vmatprep.subr.mxu1 %v4185_v3 }
 0x222   :  { %839 = vmatpush1.msra.mxu0 %v2846_v10  ;;  %2384 = vmatpush3.msra.mxu1 %v3013_v41 }
 0x223   :  { %840 = vmatprep.subr.mxu0 %v2852_v11  ;;  %2385 = vmatprep.subr.mxu1 %v4185_v3 }
 0x224   :  { %841 = vmatpush1.msra.mxu0 %v2858_v12  ;;  %2386 = vmatpush3.msra.mxu1 %v3032_v44 }
 0x225   :  { %842 = vmatprep.subr.mxu0 %v2864_v13  ;;  %2387 = vmatprep.subr.mxu1 %v4185_v3 }
 0x226   :  { %843 = vmatpush1.msra.mxu0 %v2870_v14  ;;  %2388 = vmatpush3.msra.mxu1 %v3051_v47 }
 0x227   :  { %844 = vmatprep.subr.mxu0 %v2879_v16  ;;  %2389 = vmatprep.subr.mxu1 %v4185_v3 }
 0x228   :  { %845 = vmatpush1.msra.mxu0 %v2891_v19  ;;  %2390 = vmatpush3.msra.mxu1 %v3070_v50 }
 0x229   :  { %846 = vmatprep.subr.mxu0 %v2900_v21  ;;  %2391 = vmatprep.subr.mxu1 %v4185_v3 }
 0x22a   :  { %847 = vmatpush1.msra.mxu0 %v2912_v24  ;;  %2392 = vmatpush3.msra.mxu1 %v3079_v51 }
 0x22b   :  { %848 = vmatprep.subr.mxu0 %v2918_v25  ;;  %2393 = vmatprep.subr.mxu1 %v4185_v3 }
 0x22c   :  { %849 = vmatpush1.msra.mxu0 %v2925_v26  ;;  %2394 = vmatpush3.msra.mxu1 %v3088_v52 }
 0x22d   :  { %850 = vmatprep.subr.mxu0 %v2934_v28  ;;  %2395 = vmatprep.subr.mxu1 %v4185_v3 }
 0x22e   :  { %851 = vmatpush1.msra.mxu0 %v2943_v30  ;;  %2396 = vmatpush3.msra.mxu1 %v3097_v53 }
 0x22f   :  { %852 = vmatprep.subr.mxu0 %v2950_v31  ;;  %2397 = vmatprep.subr.mxu1 %v4185_v3 }
 0x230   :  { %853 = vmatpush1.msra.mxu0 %v2957_v32  ;;  %2398 = vmatpush3.msra.mxu1 %v3106_v54 }
 0x231   :  { %854 = vmatprep.subr.mxu0 %v2963_v33  ;;  %2399 = vmatprep.subr.mxu1 %v4185_v3 }
 0x232   :  { %855 = vmatpush1.msra.mxu0 %v2969_v34  ;;  %2400 = vmatpush3.msra.mxu1 %v3115_v55 }
 0x233   :  { %856 = vmatprep.subr.mxu0 %v2981_v36  ;;  %2401 = vmatprep.subr.mxu1 %v4185_v3 }
 0x234   :  { %857 = vmatpush1.msra.mxu0 %v2988_v37  ;;  %2402 = vmatpush3.msra.mxu1 %v3124_v56 }
 0x235   :  { %858 = vmatprep.subr.mxu0 %v3000_v39  ;;  %2403 = vmatprep.subr.mxu1 %v4185_v3 }
 0x236   :  { %859 = vmatpush1.msra.mxu0 %v3007_v40  ;;  %2404 = vmatpush3.msra.mxu1 %v3133_v57 }
 0x237   :  { %860 = vmatprep.subr.mxu0 %v3019_v42  ;;  %2405 = vmatprep.subr.mxu1 %v4185_v3 }
 0x238   :  { %861 = vmatpush1.msra.mxu0 %v3026_v43  ;;  %2406 = vmatpush3.msra.mxu1 %v4193_v45 }
 0x239   :  { %862 = vmatprep.subr.mxu0 %v4194_v58  ;;  %2407 = vmatprep.subr.mxu1 %v4185_v3 }
 0x23a   :  { %863 = vmatpush1.msra.mxu0 %v4195_v18  ;;  %2408 = vmatpush3.msra.mxu1 %v4196_v15 }
 0x23b   :  { %864 = vmatprep.subr.mxu0 %v4197_v2  ;;  %2409 = vmatprep.subr.mxu1 %v4185_v3 }
 0x23c   :  { %865 = vmatpush1.msra.mxu0 %v4198_v46  ;;  %898 = vmatprep.mubr.f32.mxu0 %v4185_v3 }
 0x23d   :  { %2410 = vmatpush3.msra.mxu1 %v4199_v61  ;;  %2411 = vmatprep.mubr.msk.f32.mxu1 %vm2761_vm1, %v4185_v3 }
 0x23e   :  { %1010 = vmatprep.subr.mxu0 %v4200_v29  ;;  %2414 = vmatprep.subr.mxu1 %v4185_v3 }
 0x2dd   :  { %v724_v8 = vpop.f32.mrf.mxu0  ;;  %v795_v63 = vpop.f32.mrf.mxu1 }
 0x2de   :  { %v725_v22 = vadd.f32 %v724_v8, %v4201_v1  ;;  %v796_v8 = vadd.f32 %v795_v63, %v3255_v62 }
 0x2df   :  { %v726_v23 = vpop.f32.mrf.mxu0  ;;  %v2378_v60 = vpop.f32.mrf.mxu1 }
 0x2e0   :  { %v801_v59 = vrot.slane %v725_v22, 4  ;;  %v727_v17 = vadd.f32 %v726_v23, %v3247_v48  ;;  %v820_v60 = vrot.slane %v796_v8, 4 }
 0x2e2   :  { %v805_v4 = vadd.f32 %v801_v59, %v3245_v49  ;;  %v802_v61 = vrot.slane %v727_v17, 4 }
 0x2e4   :  { %v2074_v46 = vmul.f32 -1.442695, %v805_v4  ;;  %v806_v2 = vadd.f32 %v802_v61, %v3252_v0 }
 0x2e6   :  { %2634 = vpow2.f32 %v2074_v46  ;;  %v2075_v15 = vmul.f32 -1.442695, %v806_v2  ;;  %v827_v46 = vrot.slane %v3339_v27, 6 }
 0x2e8   :  { %2636 = vpow2.f32 %v2075_v15 }
 0x2f3   :  { %v2635_v29 = vpop.eup %2634 }
 0x2f4   :  { %v813_v18 = vadd.f32 1.0, %v2635_v29 }
 0x2f5   :  { %v2637_v58 = vpop.eup %2636 }
 0x2f6   :  { %2638 = vrcp.f32 %v813_v18  ;;  %v814_v1 = vadd.f32 1.0, %v2637_v58 }
 0x2f8   :  { %2640 = vrcp.f32 %v814_v1 }
 0x303   :  { %v2639_v22 = vpop.eup %2638 }
 0x304   :  { %v822_v45 = vmul.f32 %v2639_v22, %v820_v60 }
 0x305   :  { %v2641_v59 = vpop.eup %2640 }
 0x306   :  { %v823_v23 = vadd.f32 %v822_v45, %v3258_v20  ;;  %v825_v61 = vsub.f32 1.0, %v2641_v59  ;;  %v829_v17 = vmul.f32 %v2641_v59, %v827_v46  ;;  %v3519_v59 = vld [vmem:[%s4126_s1 + $0x180] sm:$0xff]  ;;  %v3533_v46 = vld [vmem:[%s4126_s1 + $0x168] sm:$0xff] }
 0x308   :  { %2642 = vtanh.f32 %v823_v23  ;;  %v3505_v23 = vld [vmem:[%s4126_s1 + $0x198] sm:$0xff] }
 0x315   :  { %v2643_v2 = vpop.eup %2642 }
 0x316   :  { %v826_v15 = vmul.f32 %v2643_v2, %v825_v61  ;;  %v3547_v61 = vld [vmem:[%s4126_s1 + $0x150] sm:$0xff]  ;;  %v3561_v2 = vld [vmem:[%s4126_s1 + $0x138] sm:$0xff] }
 0x318   :  { %v3416_v4 = vadd.f32 %v829_v17, %v826_v15  ;;  %v3575_v15 = vld [vmem:[%s4126_s1 + $0x120] sm:$0xff]  ;;  %v3589_v17 = vld [vmem:[%s4126_s1 + $0x108] sm:$0xff] }
 0x31a   :  { %v832_v18 = vrot.slane %v3416_v4, 4  ;;  %v1003_v63 = vrot.slane %v3416_v4, 6  ;;  %v3603_v4 = vld [vmem:[%s4126_s1 + $0xf0] sm:$0xff] }
 0x31c   :  { %899 = vmatmul.mubr.f32.vlgmr.msra.gmra.mxu0 %v832_v18  ;;  %2412 = vmatmul.mubr.f32.vlgmr.msra.gmra.mxu1 %v832_v18  ;;  %v3617_v18 = vld [vmem:[%s4126_s1 + $0xd8] sm:$0xff] }
 0x31d   :  { %1011 = vmatpush1.msra.mxu0 %v2821_v5  ;;  %2415 = vmatpush3.msra.mxu1 %v2975_v35  ;;  %v4202_v5 = vld [vmem:[#allocation16_spill] sm:$0xff] }
 0x31e   :  { %1012 = vmatprep.subr.mxu0 %v2826_v6  ;;  %2416 = vmatprep.subr.mxu1 %v4185_v3  ;;  %v4203_v6 = vld [vmem:[#allocation12_spill] sm:$0xff] }
 0x31f   :  { %1013 = vmatpush1.msra.mxu0 %v2832_v7  ;;  %2417 = vmatpush3.msra.mxu1 %v2994_v38  ;;  %v4204_v7 = vld [vmem:[#allocation13_spill] sm:$0xff] }
 0x320   :  { %1014 = vmatprep.subr.mxu0 %v2839_v9  ;;  %2418 = vmatprep.subr.mxu1 %v4185_v3  ;;  %v4205_v9 = vld [vmem:[#allocation17_spill] sm:$0xff] }
 0x321   :  { %1015 = vmatpush1.msra.mxu0 %v2846_v10  ;;  %2419 = vmatpush3.msra.mxu1 %v3013_v41  ;;  %v4206_v10 = vld [vmem:[#allocation14_spill] sm:$0xff] }
 0x322   :  { %1016 = vmatprep.subr.mxu0 %v2852_v11  ;;  %2420 = vmatprep.subr.mxu1 %v4185_v3  ;;  %v4207_v11 = vld [vmem:[#allocation15_spill] sm:$0xff] }
 0x323   :  { %1017 = vmatpush1.msra.mxu0 %v2858_v12  ;;  %2421 = vmatpush3.msra.mxu1 %v3032_v44  ;;  %v4208_v12 = vld [vmem:[#allocation18_spill] sm:$0xff] }
 0x324   :  { %1018 = vmatprep.subr.mxu0 %v2864_v13  ;;  %2422 = vmatprep.subr.mxu1 %v4185_v3  ;;  %v3487_v13 = vld [vmem:[%s4126_s1 + $0x1a0] sm:$0xff] }
 0x325   :  { %1019 = vmatpush1.msra.mxu0 %v2870_v14  ;;  %2423 = vmatpush3.msra.mxu1 %v3051_v47 }
 0x326   :  { %1020 = vmatprep.subr.mxu0 %v2879_v16  ;;  %2424 = vmatprep.subr.mxu1 %v4185_v3 }
 0x327   :  { %1021 = vmatpush1.msra.mxu0 %v2891_v19  ;;  %2425 = vmatpush3.msra.mxu1 %v3070_v50  ;;  %v4209_v19 = vld [vmem:[#allocation24_spill] sm:$0xff] }
 0x328   :  { %1022 = vmatprep.subr.mxu0 %v2900_v21  ;;  %2426 = vmatprep.subr.mxu1 %v4185_v3 }
 0x329   :  { %1023 = vmatpush1.msra.mxu0 %v2912_v24  ;;  %2427 = vmatpush3.msra.mxu1 %v3079_v51 }
 0x32a   :  { %1024 = vmatprep.subr.mxu0 %v2918_v25  ;;  %2428 = vmatprep.subr.mxu1 %v4185_v3 }
 0x32b   :  { %1025 = vmatpush1.msra.mxu0 %v2925_v26  ;;  %2429 = vmatpush3.msra.mxu1 %v3088_v52 }
 0x32c   :  { %1026 = vmatprep.subr.mxu0 %v2934_v28  ;;  %2430 = vmatprep.subr.mxu1 %v4185_v3 }
 0x32d   :  { %1027 = vmatpush1.msra.mxu0 %v2943_v30  ;;  %2431 = vmatpush3.msra.mxu1 %v3097_v53 }
 0x32e   :  { %1028 = vmatprep.subr.mxu0 %v2950_v31  ;;  %2432 = vmatprep.subr.mxu1 %v4185_v3 }
 0x32f   :  { %1029 = vmatpush1.msra.mxu0 %v2957_v32  ;;  %2433 = vmatpush3.msra.mxu1 %v3106_v54 }
 0x330   :  { %1030 = vmatprep.subr.mxu0 %v2963_v33  ;;  %2434 = vmatprep.subr.mxu1 %v4185_v3 }
 0x331   :  { %1031 = vmatpush1.msra.mxu0 %v2969_v34  ;;  %2435 = vmatpush3.msra.mxu1 %v3115_v55 }
 0x332   :  { %1032 = vmatprep.subr.mxu0 %v2981_v36  ;;  %2436 = vmatprep.subr.mxu1 %v4185_v3 }
 0x333   :  { %1033 = vmatpush1.msra.mxu0 %v2988_v37  ;;  %2437 = vmatpush3.msra.mxu1 %v3124_v56 }
 0x334   :  { %1034 = vmatprep.subr.mxu0 %v3000_v39  ;;  %2438 = vmatprep.subr.mxu1 %v4185_v3 }
 0x335   :  { %1035 = vmatpush1.msra.mxu0 %v3007_v40  ;;  %2439 = vmatpush3.msra.mxu1 %v3133_v57 }
 0x336   :  { %1036 = vmatprep.subr.mxu0 %v3019_v42  ;;  %2440 = vmatprep.subr.mxu1 %v4185_v3 }
 0x337   :  { %1037 = vmatpush1.msra.mxu0 %v3026_v43  ;;  %2441 = vmatpush3.msra.mxu1 %v4202_v5 }
 0x338   :  { %1038 = vmatprep.subr.mxu0 %v4203_v6  ;;  %2442 = vmatprep.subr.mxu1 %v4185_v3  ;;  %v3631_v6 = vld [vmem:[%s4126_s1 + $0xc0] sm:$0xff] }
 0x339   :  { %1039 = vmatpush1.msra.mxu0 %v4204_v7  ;;  %2443 = vmatpush3.msra.mxu1 %v4205_v9  ;;  %v3645_v7 = vld [vmem:[%s4126_s1 + $0xa8] sm:$0xff] }
 0x33a   :  { %1040 = vmatprep.subr.mxu0 %v4206_v10  ;;  %2444 = vmatprep.subr.mxu1 %v4185_v3  ;;  %v3659_v10 = vld [vmem:[%s4126_s1 + $0x90] sm:$0xff] }
 0x33b   :  { %1041 = vmatpush1.msra.mxu0 %v4207_v11  ;;  %1074 = vmatprep.mubr.f32.mxu0 %v4185_v3  ;;  %v3673_v11 = vld [vmem:[%s4126_s1 + $0x78] sm:$0xff] }
 0x33c   :  { %2445 = vmatpush3.msra.mxu1 %v4208_v12  ;;  %2446 = vmatprep.mubr.msk.f32.mxu1 %vm2761_vm1, %v4185_v3 }
 0x33d   :  { %1172 = vmatprep.subr.mxu0 %v3487_v13  ;;  %2449 = vmatprep.subr.mxu1 %v4185_v3 }
 0x3dc   :  { %v900_v14 = vpop.f32.mrf.mxu0  ;;  %v971_v16 = vpop.f32.mrf.mxu1 }
 0x3dd   :  { %v901_v21 = vadd.f32 %v900_v14, %v4209_v19  ;;  %v972_v40 = vadd.f32 %v971_v16, %v3255_v62  ;;  %v3687_v14 = vld [vmem:[%s4126_s1 + $0x60] sm:$0xff]  ;;  %v3701_v16 = vld [vmem:[%s4126_s1 + $0x48] sm:$0xff] }
 0x3de   :  { %v902_v24 = vpop.f32.mrf.mxu0  ;;  %v2413_v25 = vpop.f32.mrf.mxu1  ;;  %4211 = vst [vmem:[#allocation16_spill] sm:$0xff] %v3701_v16 }
 0x3df   :  { %v977_v26 = vrot.slane %v901_v21, 2  ;;  %v903_v28 = vadd.f32 %v902_v24, %v3247_v48  ;;  %v996_v43 = vrot.slane %v972_v40, 2  ;;  %v3715_v21 = vld [vmem:[%s4126_s1 + $0x30] sm:$0xff] }
 0x3e0   :  { %4213 = vst [vmem:[#allocation13_spill] sm:$0xff] %v3715_v21 }
 0x3e1   :  { %v981_v30 = vadd.f32 %v977_v26, %v3245_v49  ;;  %v978_v32 = vrot.slane %v903_v28, 2 }
 0x3e3   :  { %v2076_v31 = vmul.f32 -1.442695, %v981_v30  ;;  %v982_v33 = vadd.f32 %v978_v32, %v3252_v0  ;;  %v4214_v30 = vld [vmem:[#allocation21_spill] sm:$0xff] }
 0x3e5   :  { %2644 = vpow2.f32 %v2076_v31  ;;  %v2077_v34 = vmul.f32 -1.442695, %v982_v33 }
 0x3e7   :  { %2646 = vpow2.f32 %v2077_v34 }
 0x3f2   :  { %v2645_v36 = vpop.eup %2644 }
 0x3f3   :  { %v989_v37 = vadd.f32 1.0, %v2645_v36 }
 0x3f4   :  { %v2647_v39 = vpop.eup %2646 }
 0x3f5   :  { %2648 = vrcp.f32 %v989_v37  ;;  %v990_v42 = vadd.f32 1.0, %v2647_v39 }
 0x3f7   :  { %2650 = vrcp.f32 %v990_v42 }
 0x402   :  { %v2649_v27 = vpop.eup %2648 }
 0x403   :  { %v998_v45 = vmul.f32 %v2649_v27, %v996_v43 }
 0x404   :  { %v2651_v58 = vpop.eup %2650 }
 0x405   :  { %v999_v49 = vadd.f32 %v998_v45, %v3258_v20  ;;  %v1001_v0 = vsub.f32 1.0, %v2651_v58  ;;  %v1005_v8 = vmul.f32 %v2651_v58, %v1003_v63  ;;  %v3512_v20 = vld [vmem:[%s4126_s1 + $0x188] sm:$0xff] }
 0x407   :  { %2652 = vtanh.f32 %v999_v49  ;;  %v4216_v49 = vld [vmem:[#allocation23_spill] sm:$0xff] }
 0x414   :  { %v2653_v1 = vpop.eup %2652 }
 0x415   :  { %v1002_v29 = vmul.f32 %v2653_v1, %v1001_v0 }
 0x417   :  { %v1006_v60 = vadd.f32 %v1005_v8, %v1002_v29 }
 0x419   :  { %v3498_v22 = vrot.slane %v1006_v60, 6 }
 0x41b   :  { %1075 = vmatmul.mubr.f32.vlgmr.msra.gmra.mxu0 %v3498_v22  ;;  %2447 = vmatmul.mubr.f32.vlgmr.msra.gmra.mxu1 %v3498_v22 }
 0x41c   :  { %1173 = vmatpush1.msra.mxu0 %v3505_v23  ;;  %2450 = vmatpush3.msra.mxu1 %v2975_v35  ;;  %v3526_v35 = vld [vmem:[%s4126_s1 + $0x170] sm:$0xff] }
 0x41d   :  { %1174 = vmatprep.subr.mxu0 %v3512_v20  ;;  %2451 = vmatprep.subr.mxu1 %v4185_v3 }
 0x41e   :  { %1175 = vmatpush1.msra.mxu0 %v3519_v59  ;;  %2452 = vmatpush3.msra.mxu1 %v2994_v38  ;;  %v3540_v38 = vld [vmem:[%s4126_s1 + $0x158] sm:$0xff] }
 0x41f   :  { %1176 = vmatprep.subr.mxu0 %v3526_v35  ;;  %2453 = vmatprep.subr.mxu1 %v4185_v3 }
 0x420   :  { %1177 = vmatpush1.msra.mxu0 %v3533_v46  ;;  %2454 = vmatpush3.msra.mxu1 %v3013_v41  ;;  %v3554_v41 = vld [vmem:[%s4126_s1 + $0x140] sm:$0xff] }
 0x421   :  { %1178 = vmatprep.subr.mxu0 %v3540_v38  ;;  %2455 = vmatprep.subr.mxu1 %v4185_v3 }
 0x422   :  { %1179 = vmatpush1.msra.mxu0 %v3547_v61  ;;  %2456 = vmatpush3.msra.mxu1 %v3032_v44  ;;  %v3568_v44 = vld [vmem:[%s4126_s1 + $0x128] sm:$0xff] }
 0x423   :  { %1180 = vmatprep.subr.mxu0 %v3554_v41  ;;  %2457 = vmatprep.subr.mxu1 %v4185_v3 }
 0x424   :  { %1181 = vmatpush1.msra.mxu0 %v3561_v2  ;;  %2458 = vmatpush3.msra.mxu1 %v3051_v47  ;;  %v3582_v47 = vld [vmem:[%s4126_s1 + $0x110] sm:$0xff] }
 0x425   :  { %1182 = vmatprep.subr.mxu0 %v3568_v44  ;;  %2459 = vmatprep.subr.mxu1 %v4185_v3 }
 0x426   :  { %1183 = vmatpush1.msra.mxu0 %v3575_v15  ;;  %2460 = vmatpush3.msra.mxu1 %v3070_v50  ;;  %v3596_v50 = vld [vmem:[%s4126_s1 + $0xf8] sm:$0xff] }
 0x427   :  { %1184 = vmatprep.subr.mxu0 %v3582_v47  ;;  %2461 = vmatprep.subr.mxu1 %v4185_v3 }
 0x428   :  { %1185 = vmatpush1.msra.mxu0 %v3589_v17  ;;  %2462 = vmatpush3.msra.mxu1 %v3079_v51  ;;  %v3610_v51 = vld [vmem:[%s4126_s1 + $0xe0] sm:$0xff] }
 0x429   :  { %1186 = vmatprep.subr.mxu0 %v3596_v50  ;;  %2463 = vmatprep.subr.mxu1 %v4185_v3 }
 0x42a   :  { %1187 = vmatpush1.msra.mxu0 %v3603_v4  ;;  %2464 = vmatpush3.msra.mxu1 %v3088_v52  ;;  %v3624_v52 = vld [vmem:[%s4126_s1 + $0xc8] sm:$0xff] }
 0x42b   :  { %1188 = vmatprep.subr.mxu0 %v3610_v51  ;;  %2465 = vmatprep.subr.mxu1 %v4185_v3 }
 0x42c   :  { %1189 = vmatpush1.msra.mxu0 %v3617_v18  ;;  %2466 = vmatpush3.msra.mxu1 %v3097_v53  ;;  %v3638_v53 = vld [vmem:[%s4126_s1 + $0xb0] sm:$0xff] }
 0x42d   :  { %1190 = vmatprep.subr.mxu0 %v3624_v52  ;;  %2467 = vmatprep.subr.mxu1 %v4185_v3 }
 0x42e   :  { %1191 = vmatpush1.msra.mxu0 %v3631_v6  ;;  %2468 = vmatpush3.msra.mxu1 %v3106_v54  ;;  %v3652_v54 = vld [vmem:[%s4126_s1 + $0x98] sm:$0xff] }
 0x42f   :  { %1192 = vmatprep.subr.mxu0 %v3638_v53  ;;  %2469 = vmatprep.subr.mxu1 %v4185_v3 }
 0x430   :  { %1193 = vmatpush1.msra.mxu0 %v3645_v7  ;;  %2470 = vmatpush3.msra.mxu1 %v3115_v55  ;;  %v3666_v55 = vld [vmem:[%s4126_s1 + $0x80] sm:$0xff] }
 0x431   :  { %1194 = vmatprep.subr.mxu0 %v3652_v54  ;;  %2471 = vmatprep.subr.mxu1 %v4185_v3 }
 0x432   :  { %1195 = vmatpush1.msra.mxu0 %v3659_v10  ;;  %2472 = vmatpush3.msra.mxu1 %v3124_v56  ;;  %v3680_v56 = vld [vmem:[%s4126_s1 + $0x68] sm:$0xff] }
 0x433   :  { %1196 = vmatprep.subr.mxu0 %v3666_v55  ;;  %2473 = vmatprep.subr.mxu1 %v4185_v3 }
 0x434   :  { %1197 = vmatpush1.msra.mxu0 %v3673_v11  ;;  %2474 = vmatpush3.msra.mxu1 %v3133_v57  ;;  %v3694_v57 = vld [vmem:[%s4126_s1 + $0x50] sm:$0xff] }
 0x435   :  { %1198 = vmatprep.subr.mxu0 %v3680_v56  ;;  %2475 = vmatprep.subr.mxu1 %v4185_v3  ;;  %4210 = vst [vmem:[#allocation11_spill] sm:$0xff] %v3694_v57 }
 0x436   :  { %1199 = vmatpush1.msra.mxu0 %v3687_v14  ;;  %2476 = vmatpush3.msra.mxu1 %v4202_v5  ;;  %v3708_v5 = vld [vmem:[%s4126_s1 + $0x38] sm:$0xff] }
 0x437   :  { %1200 = vmatprep.subr.mxu0 %v3694_v57  ;;  %2477 = vmatprep.subr.mxu1 %v4185_v3  ;;  %4212 = vst [vmem:[#allocation12_spill] sm:$0xff] %v3708_v5 }
 0x438   :  { %1201 = vmatpush1.msra.mxu0 %v3701_v16  ;;  %2478 = vmatpush3.msra.mxu1 %v4205_v9 }
 0x439   :  { %1202 = vmatprep.subr.mxu0 %v3708_v5  ;;  %2479 = vmatprep.subr.mxu1 %v4185_v3 }
 0x43a   :  { %1203 = vmatpush1.msra.mxu0 %v3715_v21  ;;  %1236 = vmatprep.mubr.f32.mxu0 %v4185_v3 }
 0x43b   :  { %2480 = vmatpush3.msra.mxu1 %v4208_v12  ;;  %2481 = vmatprep.mubr.msk.f32.mxu1 %vm2761_vm1, %v4185_v3  ;;  %v4215_v12 = vld [vmem:[#allocation22_spill] sm:$0xff] }
 0x43c   :  { %1349 = vmatprep.subr.mxu0 %v3487_v13  ;;  %2484 = vmatprep.subr.mxu1 %v4185_v3 }
 0x4db   :  { %v1076_v9 = vpop.f32.mrf.mxu0  ;;  %v1147_v24 = vpop.f32.mrf.mxu1 }
 0x4dc   :  { %v1077_v25 = vadd.f32 %v1076_v9, %v4209_v19  ;;  %v1148_v43 = vadd.f32 %v1147_v24, %v3255_v62  ;;  %v3739_v9 = vld [vmem:[%s4126_s1 + $0x1a8] sm:$0xff]  ;;  %v3757_v24 = vld [vmem:[%s4126_s1 + $0x178] sm:$0xff] }
 0x4dd   :  { %v1078_v26 = vpop.f32.mrf.mxu0  ;;  %v2448_v28 = vpop.f32.mrf.mxu1 }
 0x4de   :  { %v1151_v31 = vadd.f32 %v1077_v25, %v4214_v30  ;;  %v1079_v33 = vadd.f32 %v1078_v26, %v3247_v48  ;;  %v3766_v25 = vld [vmem:[%s4126_s1 + $0x160] sm:$0xff]  ;;  %v3775_v26 = vld [vmem:[%s4126_s1 + $0x148] sm:$0xff]  ;;  %v3784_v28 = vld [vmem:[%s4126_s1 + $0x130] sm:$0xff] }
 0x4e0   :  { %v2078_v32 = vmul.f32 -1.442695, %v1151_v31  ;;  %v1152_v34 = vadd.f32 %v1079_v33, %v4215_v12  ;;  %v3793_v31 = vld [vmem:[%s4126_s1 + $0x118] sm:$0xff]  ;;  %v3811_v33 = vld [vmem:[%s4126_s1 + $0xe8] sm:$0xff] }
 0x4e2   :  { %2654 = vpow2.f32 %v2078_v32  ;;  %v2079_v36 = vmul.f32 -1.442695, %v1152_v34  ;;  %v3802_v32 = vld [vmem:[%s4126_s1 + $0x100] sm:$0xff]  ;;  %v3820_v34 = vld [vmem:[%s4126_s1 + $0xd0] sm:$0xff] }
 0x4e4   :  { %2656 = vpow2.f32 %v2079_v36  ;;  %v3829_v36 = vld [vmem:[%s4126_s1 + $0xb8] sm:$0xff] }
 0x4ef   :  { %v2655_v37 = vpop.eup %2654 }
 0x4f0   :  { %v1159_v39 = vadd.f32 1.0, %v2655_v37  ;;  %v3838_v37 = vld [vmem:[%s4126_s1 + $0xa0] sm:$0xff] }
 0x4f1   :  { %v2657_v40 = vpop.eup %2656 }
 0x4f2   :  { %2658 = vrcp.f32 %v1159_v39  ;;  %v1160_v42 = vadd.f32 1.0, %v2657_v40  ;;  %v3847_v39 = vld [vmem:[%s4126_s1 + $0x88] sm:$0xff]  ;;  %v3856_v40 = vld [vmem:[%s4126_s1 + $0x70] sm:$0xff] }
 0x4f3   :  { %4217 = vst [vmem:[#allocation17_spill] sm:$0xff] %v3856_v40 }
 0x4f4   :  { %2660 = vrcp.f32 %v1160_v42  ;;  %v3865_v42 = vld [vmem:[%s4126_s1 + $0x58] sm:$0xff] }
 0x4f5   :  { %4218 = vst [vmem:[#allocation14_spill] sm:$0xff] %v3865_v42 }
 0x4ff   :  { %v2659_v27 = vpop.eup %2658 }
 0x500   :  { %v1165_v45 = vmul.f32 %v2659_v27, %v1148_v43  ;;  %v3875_v43 = vld [vmem:[%s4126_s1 + $0x40] sm:$0xff] }
 0x501   :  { %v2661_v63 = vpop.eup %2660  ;;  %4219 = vst [vmem:[#allocation15_spill] sm:$0xff] %v3875_v43 }
 0x502   :  { %v1166_v58 = vadd.f32 %v1165_v45, %v4216_v49  ;;  %v1168_v0 = vsub.f32 1.0, %v2661_v63  ;;  %v1170_v8 = vmul.f32 %v2661_v63, %v3498_v22  ;;  %v3748_v22 = vld [vmem:[%s4126_s1 + $0x190] sm:$0xff] }
 0x504   :  { %2662 = vtanh.f32 %v1166_v58 }
 0x511   :  { %v2663_v1 = vpop.eup %2662 }
 0x512   :  { %v1169_v29 = vmul.f32 %v2663_v1, %v1168_v0 }
 0x514   :  { %v3731_v60 = vadd.f32 %v1170_v8, %v1169_v29 }
 0x516   :  { %1237 = vmatmul.mubr.f32.vlgmr.msra.gmra.mxu0 %v3731_v60  ;;  %2482 = vmatmul.mubr.f32.vlgmr.msra.gmra.mxu1 %v3731_v60 }
 0x517   :  { %1350 = vmatpush1.msra.mxu0 %v3505_v23  ;;  %2485 = vmatpush3.msra.mxu1 %v3739_v9 }
 0x518   :  { %1351 = vmatprep.subr.mxu0 %v3512_v20  ;;  %2486 = vmatprep.subr.mxu1 %v4185_v3 }
 0x519   :  { %1352 = vmatpush1.msra.mxu0 %v3519_v59  ;;  %2487 = vmatpush3.msra.mxu1 %v3748_v22 }
 0x51a   :  { %1353 = vmatprep.subr.mxu0 %v3526_v35  ;;  %2488 = vmatprep.subr.mxu1 %v4185_v3 }
 0x51b   :  { %1354 = vmatpush1.msra.mxu0 %v3533_v46  ;;  %2489 = vmatpush3.msra.mxu1 %v3757_v24 }
 0x51c   :  { %1355 = vmatprep.subr.mxu0 %v3540_v38  ;;  %2490 = vmatprep.subr.mxu1 %v4185_v3 }
 0x51d   :  { %1356 = vmatpush1.msra.mxu0 %v3547_v61  ;;  %2491 = vmatpush3.msra.mxu1 %v3766_v25 }
 0x51e   :  { %1357 = vmatprep.subr.mxu0 %v3554_v41  ;;  %2492 = vmatprep.subr.mxu1 %v4185_v3 }
 0x51f   :  { %1358 = vmatpush1.msra.mxu0 %v3561_v2  ;;  %2493 = vmatpush3.msra.mxu1 %v3775_v26 }
 0x520   :  { %1359 = vmatprep.subr.mxu0 %v3568_v44  ;;  %2494 = vmatprep.subr.mxu1 %v4185_v3 }
 0x521   :  { %1360 = vmatpush1.msra.mxu0 %v3575_v15  ;;  %2495 = vmatpush3.msra.mxu1 %v3784_v28 }
 0x522   :  { %1361 = vmatprep.subr.mxu0 %v3582_v47  ;;  %2496 = vmatprep.subr.mxu1 %v4185_v3 }
 0x523   :  { %1362 = vmatpush1.msra.mxu0 %v3589_v17  ;;  %2497 = vmatpush3.msra.mxu1 %v3793_v31 }
 0x524   :  { %1363 = vmatprep.subr.mxu0 %v3596_v50  ;;  %2498 = vmatprep.subr.mxu1 %v4185_v3 }
 0x525   :  { %1364 = vmatpush1.msra.mxu0 %v3603_v4  ;;  %2499 = vmatpush3.msra.mxu1 %v3802_v32 }
 0x526   :  { %1365 = vmatprep.subr.mxu0 %v3610_v51  ;;  %2500 = vmatprep.subr.mxu1 %v4185_v3 }
 0x527   :  { %1366 = vmatpush1.msra.mxu0 %v3617_v18  ;;  %2501 = vmatpush3.msra.mxu1 %v3811_v33 }
 0x528   :  { %1367 = vmatprep.subr.mxu0 %v3624_v52  ;;  %2502 = vmatprep.subr.mxu1 %v4185_v3 }
 0x529   :  { %1368 = vmatpush1.msra.mxu0 %v3631_v6  ;;  %2503 = vmatpush3.msra.mxu1 %v3820_v34 }
 0x52a   :  { %1369 = vmatprep.subr.mxu0 %v3638_v53  ;;  %2504 = vmatprep.subr.mxu1 %v4185_v3 }
 0x52b   :  { %1370 = vmatpush1.msra.mxu0 %v3645_v7  ;;  %2505 = vmatpush3.msra.mxu1 %v3829_v36 }
 0x52c   :  { %1371 = vmatprep.subr.mxu0 %v3652_v54  ;;  %2506 = vmatprep.subr.mxu1 %v4185_v3 }
 0x52d   :  { %1372 = vmatpush1.msra.mxu0 %v3659_v10  ;;  %2507 = vmatpush3.msra.mxu1 %v3838_v37 }
 0x52e   :  { %1373 = vmatprep.subr.mxu0 %v3666_v55  ;;  %2508 = vmatprep.subr.mxu1 %v4185_v3 }
 0x52f   :  { %1374 = vmatpush1.msra.mxu0 %v3673_v11  ;;  %2509 = vmatpush3.msra.mxu1 %v3847_v39 }
 0x530   :  { %1375 = vmatprep.subr.mxu0 %v3680_v56  ;;  %2510 = vmatprep.subr.mxu1 %v4185_v3 }
 0x531   :  { %1376 = vmatpush1.msra.mxu0 %v3687_v14  ;;  %2511 = vmatpush3.msra.mxu1 %v3856_v40 }
 0x532   :  { %1377 = vmatprep.subr.mxu0 %v3694_v57  ;;  %2512 = vmatprep.subr.mxu1 %v4185_v3 }
 0x533   :  { %1378 = vmatpush1.msra.mxu0 %v3701_v16  ;;  %2513 = vmatpush3.msra.mxu1 %v3865_v42 }
 0x534   :  { %1379 = vmatprep.subr.mxu0 %v3708_v5  ;;  %2514 = vmatprep.subr.mxu1 %v4185_v3 }
 0x535   :  { %1380 = vmatpush1.msra.mxu0 %v3715_v21  ;;  %1413 = vmatprep.mubr.f32.mxu0 %v4185_v3 }
 0x536   :  { %2515 = vmatpush3.msra.mxu1 %v3875_v43  ;;  %2516 = vmatprep.mubr.msk.f32.mxu1 %vm2761_vm1, %v4185_v3 }
 0x537   :  { %1525 = vmatprep.subr.mxu0 %v3487_v13  ;;  %2519 = vmatprep.subr.mxu1 %v4185_v3 }
 0x5d6   :  { %v1238_v27 = vpop.f32.mrf.mxu0  ;;  %v1309_v45 = vpop.f32.mrf.mxu1 }
 0x5d7   :  { %v1239_v58 = vadd.f32 %v1238_v27, %v4209_v19  ;;  %v1310_v27 = vadd.f32 %v1309_v45, %v3255_v62  ;;  %v4001_v45 = vld [vmem:[%s4127_s2 + $0x8] sm:$0xff] }
 0x5d8   :  { %v1240_v63 = vpop.f32.mrf.mxu0  ;;  %v2483_v0 = vpop.f32.mrf.mxu1 }
 0x5d9   :  { %v1315_v1 = vrot.slane %v1239_v58, 6  ;;  %v1241_v29 = vadd.f32 %v1240_v63, %v3247_v48  ;;  %v1334_v0 = vrot.slane %v1310_v27, 6  ;;  %v4012_v27 = vld [vmem:[%s4127_s2 + $0x18] sm:$0xff] }
 0x5db   :  { %v1319_v8 = vadd.f32 %v1315_v1, %v4214_v30  ;;  %v1316_v43 = vrot.slane %v1241_v29, 6 }
 0x5dd   :  { %v2080_v21 = vmul.f32 -1.442695, %v1319_v8  ;;  %v1320_v5 = vadd.f32 %v1316_v43, %v4215_v12 }
 0x5df   :  { %2664 = vpow2.f32 %v2080_v21  ;;  %v2081_v42 = vmul.f32 -1.442695, %v1320_v5  ;;  %v1342_v21 = vrot.slane %v3731_v60, 6 }
 0x5e1   :  { %2666 = vpow2.f32 %v2081_v42 }
 0x5ec   :  { %v2665_v13 = vpop.eup %2664 }
 0x5ed   :  { %v1327_v16 = vadd.f32 1.0, %v2665_v13  ;;  %v4006_v13 = vld [vmem:[%s4127_s2 + $0x10] sm:$0xff] }
 0x5ee   :  { %v2667_v57 = vpop.eup %2666 }
 0x5ef   :  { %2668 = vrcp.f32 %v1327_v16  ;;  %v1328_v19 = vadd.f32 1.0, %v2667_v57 }
 0x5f1   :  { %2670 = vrcp.f32 %v1328_v19  ;;  %v4220_v19 = vld [vmem:[#allocation17_spill] sm:$0xff] }
 0x5fc   :  { %v2669_v58 = vpop.eup %2668 }
 0x5fd   :  { %v1336_v40 = vmul.f32 %v2669_v58, %v1334_v0  ;;  %v4017_v0 = vld [vmem:[%s4127_s2 + $0x20] sm:$0xff]  ;;  %v4022_v58 = vld [vmem:[%s4127_s2 + $0x28] sm:$0xff] }
 0x5fe   :  { %v2671_v1 = vpop.eup %2670 }
 0x5ff   :  { %v1337_v63 = vadd.f32 %v1336_v40, %v4216_v49  ;;  %v1339_v43 = vsub.f32 1.0, %v2671_v1  ;;  %v1344_v29 = vmul.f32 %v2671_v1, %v1342_v21  ;;  %v3996_v40 = vld [vmem:[%s4127_s2] sm:$0xff]  ;;  %v4032_v1 = vld [vmem:[%s4127_s2 + $0x38] sm:$0xff]  ;;  %v1715_v21 = vld [vmem:[%s4127_s2 + $0x88] sm:$0xff] }
 0x601   :  { %2672 = vtanh.f32 %v1337_v63  ;;  %v4027_v63 = vld [vmem:[%s4127_s2 + $0x30] sm:$0xff] }
 0x60e   :  { %v2673_v5 = vpop.eup %2672 }
 0x60f   :  { %v1340_v42 = vmul.f32 %v2673_v5, %v1339_v43  ;;  %v1714_v43 = vld [vmem:[%s4127_s2 + $0x80] sm:$0xff]  ;;  %v1713_v5 = vld [vmem:[%s4127_s2 + $0x78] sm:$0xff] }
 0x611   :  { %v3889_v8 = vadd.f32 %v1344_v29, %v1340_v42  ;;  %v1712_v42 = vld [vmem:[%s4127_s2 + $0x70] sm:$0xff]  ;;  %v1711_v29 = vld [vmem:[%s4127_s2 + $0x68] sm:$0xff] }
 0x613   :  { %v1347_v16 = vrot.slane %v3889_v8, 2 }
 0x615   :  { %1414 = vmatmul.mubr.f32.vlgmr.msra.gmra.mxu0 %v1347_v16  ;;  %2517 = vmatmul.mubr.f32.vlgmr.msra.gmra.mxu1 %v1347_v16  ;;  %v1709_v16 = vld [vmem:[%s4127_s2 + $0x58] sm:$0xff] }
 0x616   :  { %1526 = vmatpush1.msra.mxu0 %v3505_v23  ;;  %2520 = vmatpush3.msra.mxu1 %v3739_v9  ;;  %v4221_v23 = vld [vmem:[#allocation11_spill] sm:$0xff]  ;;  %v1518_v9 = vrot.slane %v3889_v8, 6 }
 0x617   :  { %1527 = vmatprep.subr.mxu0 %v3512_v20  ;;  %2521 = vmatprep.subr.mxu1 %v4185_v3  ;;  %v4222_v20 = vld [vmem:[#allocation16_spill] sm:$0xff]  ;;  %v1710_v8 = vld [vmem:[%s4127_s2 + $0x60] sm:$0xff] }
 0x618   :  { %1528 = vmatpush1.msra.mxu0 %v3519_v59  ;;  %2522 = vmatpush3.msra.mxu1 %v3748_v22  ;;  %v4223_v59 = vld [vmem:[#allocation14_spill] sm:$0xff] }
 0x619   :  { %1529 = vmatprep.subr.mxu0 %v3526_v35  ;;  %2523 = vmatprep.subr.mxu1 %v4185_v3  ;;  %v4224_v35 = vld [vmem:[#allocation12_spill] sm:$0xff] }
 0x61a   :  { %1530 = vmatpush1.msra.mxu0 %v3533_v46  ;;  %2524 = vmatpush3.msra.mxu1 %v3757_v24  ;;  %v4225_v46 = vld [vmem:[#allocation13_spill] sm:$0xff] }
 0x61b   :  { %1531 = vmatprep.subr.mxu0 %v3540_v38  ;;  %2525 = vmatprep.subr.mxu1 %v4185_v3  ;;  %v4226_v38 = vld [vmem:[#allocation15_spill] sm:$0xff] }
 0x61c   :  { %1532 = vmatpush1.msra.mxu0 %v3547_v61  ;;  %2526 = vmatpush3.msra.mxu1 %v3766_v25 }
 0x61d   :  { %1533 = vmatprep.subr.mxu0 %v3554_v41  ;;  %2527 = vmatprep.subr.mxu1 %v4185_v3 }
 0x61e   :  { %1534 = vmatpush1.msra.mxu0 %v3561_v2  ;;  %2528 = vmatpush3.msra.mxu1 %v3775_v26  ;;  %v4227_v2 = vld [vmem:[#allocation24_spill] sm:$0xff] }
 0x61f   :  { %1535 = vmatprep.subr.mxu0 %v3568_v44  ;;  %2529 = vmatprep.subr.mxu1 %v4185_v3 }
 0x620   :  { %1536 = vmatpush1.msra.mxu0 %v3575_v15  ;;  %2530 = vmatpush3.msra.mxu1 %v3784_v28 }
 0x621   :  { %1537 = vmatprep.subr.mxu0 %v3582_v47  ;;  %2531 = vmatprep.subr.mxu1 %v4185_v3 }
 0x622   :  { %1538 = vmatpush1.msra.mxu0 %v3589_v17  ;;  %2532 = vmatpush3.msra.mxu1 %v3793_v31 }
 0x623   :  { %1539 = vmatprep.subr.mxu0 %v3596_v50  ;;  %2533 = vmatprep.subr.mxu1 %v4185_v3 }
 0x624   :  { %1540 = vmatpush1.msra.mxu0 %v3603_v4  ;;  %2534 = vmatpush3.msra.mxu1 %v3802_v32  ;;  %v1721_v32 = vld [vmem:[%s4127_s2 + $0xb8] sm:$0xff] }
 0x625   :  { %1541 = vmatprep.subr.mxu0 %v3610_v51  ;;  %2535 = vmatprep.subr.mxu1 %v4185_v3 }
 0x626   :  { %1542 = vmatpush1.msra.mxu0 %v3617_v18  ;;  %2536 = vmatpush3.msra.mxu1 %v3811_v33  ;;  %v1720_v33 = vld [vmem:[%s4127_s2 + $0xb0] sm:$0xff] }
 0x627   :  { %1543 = vmatprep.subr.mxu0 %v3624_v52  ;;  %2537 = vmatprep.subr.mxu1 %v4185_v3 }
 0x628   :  { %1544 = vmatpush1.msra.mxu0 %v3631_v6  ;;  %2538 = vmatpush3.msra.mxu1 %v3820_v34  ;;  %v1719_v34 = vld [vmem:[%s4127_s2 + $0xa8] sm:$0xff] }
 0x629   :  { %1545 = vmatprep.subr.mxu0 %v3638_v53  ;;  %2539 = vmatprep.subr.mxu1 %v4185_v3 }
 0x62a   :  { %1546 = vmatpush1.msra.mxu0 %v3645_v7  ;;  %2540 = vmatpush3.msra.mxu1 %v3829_v36  ;;  %v1718_v36 = vld [vmem:[%s4127_s2 + $0xa0] sm:$0xff] }
 0x62b   :  { %1547 = vmatprep.subr.mxu0 %v3652_v54  ;;  %2541 = vmatprep.subr.mxu1 %v4185_v3 }
 0x62c   :  { %1548 = vmatpush1.msra.mxu0 %v3659_v10  ;;  %2542 = vmatpush3.msra.mxu1 %v3838_v37  ;;  %v1717_v37 = vld [vmem:[%s4127_s2 + $0x98] sm:$0xff] }
 0x62d   :  { %1549 = vmatprep.subr.mxu0 %v3666_v55  ;;  %2543 = vmatprep.subr.mxu1 %v4185_v3 }
 0x62e   :  { %1550 = vmatpush1.msra.mxu0 %v3673_v11  ;;  %2544 = vmatpush3.msra.mxu1 %v3847_v39  ;;  %v1716_v39 = vld [vmem:[%s4127_s2 + $0x90] sm:$0xff] }
 0x62f   :  { %1551 = vmatprep.subr.mxu0 %v3680_v56  ;;  %2545 = vmatprep.subr.mxu1 %v4185_v3 }
 0x630   :  { %1552 = vmatpush1.msra.mxu0 %v3687_v14  ;;  %2546 = vmatpush3.msra.mxu1 %v4220_v19  ;;  %v1708_v19 = vld [vmem:[%s4127_s2 + $0x50] sm:$0xff] }
 0x631   :  { %1553 = vmatprep.subr.mxu0 %v4221_v23  ;;  %2547 = vmatprep.subr.mxu1 %v4185_v3  ;;  %v1707_v23 = vld [vmem:[%s4127_s2 + $0x48] sm:$0xff] }
 0x632   :  { %1554 = vmatpush1.msra.mxu0 %v4222_v20  ;;  %2548 = vmatpush3.msra.mxu1 %v4223_v59  ;;  %v1706_v20 = vld [vmem:[%s4127_s2 + $0x40] sm:$0xff] }
 0x633   :  { %1555 = vmatprep.subr.mxu0 %v4224_v35  ;;  %2549 = vmatprep.subr.mxu1 %v4185_v3 }
 0x634   :  { %1556 = vmatpush1.msra.mxu0 %v4225_v46  ;;  %1589 = vmatprep.mubr.f32.mxu0 %v4185_v3 }
 0x635   :  { %2550 = vmatpush3.msra.mxu1 %v4226_v38  ;;  %2551 = vmatprep.mubr.msk.f32.mxu1 %vm2761_vm1, %v4185_v3 }
 0x636   :  { %2554 = vmatprep.subr.mxu0 %v4185_v3  ;;  %2589 = vmatprep.subr.mxu1 %v4032_v1 }
 0x6d5   :  { %v1415_v61 = vpop.f32.mrf.mxu0  ;;  %v1486_v41 = vpop.f32.mrf.mxu1 }
 0x6d6   :  { %v1416_v44 = vadd.f32 %v1415_v61, %v4227_v2  ;;  %v1487_v10 = vadd.f32 %v1486_v41, %v3255_v62 }
 0x6d7   :  { %v1417_v15 = vpop.f32.mrf.mxu0  ;;  %v2518_v47 = vpop.f32.mrf.mxu1 }
 0x6d8   :  { %v1492_v17 = vrot.slane %v1416_v44, 4  ;;  %v1418_v50 = vadd.f32 %v1417_v15, %v3247_v48  ;;  %v1511_v11 = vrot.slane %v1487_v10, 4 }
 0x6da   :  { %v1496_v4 = vadd.f32 %v1492_v17, %v4214_v30  ;;  %v1493_v18 = vrot.slane %v1418_v50, 4 }
 0x6dc   :  { %v2082_v51 = vmul.f32 -1.442695, %v1496_v4  ;;  %v1497_v52 = vadd.f32 %v1493_v18, %v4215_v12 }
 0x6de   :  { %2674 = vpow2.f32 %v2082_v51  ;;  %v2083_v6 = vmul.f32 -1.442695, %v1497_v52 }
 0x6e0   :  { %2676 = vpow2.f32 %v2083_v6 }
 0x6eb   :  { %v2675_v53 = vpop.eup %2674 }
 0x6ec   :  { %v1504_v7 = vadd.f32 1.0, %v2675_v53 }
 0x6ed   :  { %v2677_v54 = vpop.eup %2676 }
 0x6ee   :  { %2678 = vrcp.f32 %v1504_v7  ;;  %v1505_v55 = vadd.f32 1.0, %v2677_v54 }
 0x6f0   :  { %2680 = vrcp.f32 %v1505_v55 }
 0x6fb   :  { %v2679_v56 = vpop.eup %2678 }
 0x6fc   :  { %v1513_v14 = vmul.f32 %v2679_v56, %v1511_v11 }
 0x6fd   :  { %v2681_v60 = vpop.eup %2680 }
 0x6fe   :  { %v1514_v57 = vadd.f32 %v1513_v14, %v4216_v49  ;;  %v1516_v22 = vsub.f32 1.0, %v2681_v60  ;;  %v1520_v26 = vmul.f32 %v2681_v60, %v1518_v9 }
 0x700   :  { %2682 = vtanh.f32 %v1514_v57 }
 0x70d   :  { %v2683_v24 = vpop.eup %2682 }
 0x70e   :  { %v1517_v25 = vmul.f32 %v2683_v24, %v1516_v22 }
 0x710   :  { %v3965_v28 = vadd.f32 %v1520_v26, %v1517_v25 }
 0x712   :  { %v1523_v31 = vrot.slane %v3965_v28, 4  ;;  %v1694_v54 = vrot.slane %v3965_v28, 6 }
 0x714   :  { %1590 = vmatmul.mubr.f32.vlgmr.msra.gmra.mxu0 %v1523_v31  ;;  %2552 = vmatmul.mubr.f32.vlgmr.msra.gmra.mxu1 %v1523_v31 }
 0x715   :  { %2586 = vmatprep.mubr.msk.f32.mxu0 %vm2761_vm1, %v4185_v3  ;;  %2555 = vmatpush3.msra.mxu0 %v1721_v32 }
 0x716   :  { %2556 = vmatprep.subr.mxu0 %v4185_v3 }
 0x717   :  { %2557 = vmatpush3.msra.mxu0 %v1720_v33 }
 0x718   :  { %2558 = vmatprep.subr.mxu0 %v4185_v3 }
 0x719   :  { %2559 = vmatpush3.msra.mxu0 %v1719_v34 }
 0x71a   :  { %2560 = vmatprep.subr.mxu0 %v4185_v3 }
 0x71b   :  { %2561 = vmatpush3.msra.mxu0 %v1718_v36 }
 0x71c   :  { %2562 = vmatprep.subr.mxu0 %v4185_v3 }
 0x71d   :  { %2563 = vmatpush3.msra.mxu0 %v1717_v37 }
 0x71e   :  { %2564 = vmatprep.subr.mxu0 %v4185_v3 }
 0x71f   :  { %2565 = vmatpush3.msra.mxu0 %v1716_v39 }
 0x720   :  { %2566 = vmatprep.subr.mxu0 %v4185_v3 }
 0x721   :  { %2567 = vmatpush3.msra.mxu0 %v1715_v21 }
 0x722   :  { %2568 = vmatprep.subr.mxu0 %v4185_v3 }
 0x723   :  { %2569 = vmatpush3.msra.mxu0 %v1714_v43 }
 0x724   :  { %2570 = vmatprep.subr.mxu0 %v4185_v3 }
 0x725   :  { %2571 = vmatpush3.msra.mxu0 %v1713_v5 }
 0x726   :  { %2572 = vmatprep.subr.mxu0 %v4185_v3 }
 0x727   :  { %2573 = vmatpush3.msra.mxu0 %v1712_v42 }
 0x728   :  { %2574 = vmatprep.subr.mxu0 %v4185_v3 }
 0x729   :  { %2575 = vmatpush3.msra.mxu0 %v1711_v29 }
 0x72a   :  { %2576 = vmatprep.subr.mxu0 %v4185_v3 }
 0x72b   :  { %2577 = vmatpush3.msra.mxu0 %v1710_v8 }
 0x72c   :  { %2578 = vmatprep.subr.mxu0 %v4185_v3 }
 0x72d   :  { %2579 = vmatpush3.msra.mxu0 %v1709_v16 }
 0x72e   :  { %2580 = vmatprep.subr.mxu0 %v4185_v3 }
 0x72f   :  { %2581 = vmatpush3.msra.mxu0 %v1708_v19 }
 0x730   :  { %2582 = vmatprep.subr.mxu0 %v4185_v3 }
 0x731   :  { %2583 = vmatpush3.msra.mxu0 %v1707_v23 }
 0x732   :  { %2584 = vmatprep.subr.mxu0 %v4185_v3 }
 0x733   :  { %2585 = vmatpush3.msra.mxu0 %v1706_v20 }
 0x7d4   :  { %v1591_v59 = vpop.f32.mrf.mxu0  ;;  %v1662_v35 = vpop.f32.mrf.mxu1 }
 0x7d5   :  { %v1592_v46 = vadd.f32 %v1591_v59, %v4227_v2  ;;  %v1663_v2 = vadd.f32 %v1662_v35, %v3255_v62  ;;  %v2086_v62 = vld [vmem:[%s4127_s2 + $0xc8] ss:$0 sm:$0xff] }
 0x7d6   :  { %v1593_v38 = vpop.f32.mrf.mxu0  ;;  %v2553_v61 = vpop.f32.mrf.mxu1 }
 0x7d7   :  { %v1668_v41 = vrot.slane %v1592_v46, 2  ;;  %v1594_v44 = vadd.f32 %v1593_v38, %v3247_v48  ;;  %v1687_v6 = vrot.slane %v1663_v2, 2 }
 0x7d9   :  { %v1672_v15 = vadd.f32 %v1668_v41, %v4214_v30  ;;  %v1669_v17 = vrot.slane %v1594_v44, 2 }
 0x7db   :  { %v2084_v47 = vmul.f32 -1.442695, %v1672_v15  ;;  %v1673_v50 = vadd.f32 %v1669_v17, %v4215_v12 }
 0x7dd   :  { %2684 = vpow2.f32 %v2084_v47  ;;  %v2085_v4 = vmul.f32 -1.442695, %v1673_v50 }
 0x7df   :  { %2686 = vpow2.f32 %v2085_v4 }
 0x7ea   :  { %v2685_v3 = vpop.eup %2684 }
 0x7eb   :  { %v1680_v51 = vadd.f32 1.0, %v2685_v3 }
 0x7ec   :  { %v2687_v18 = vpop.eup %2686 }
 0x7ed   :  { %2688 = vrcp.f32 %v1680_v51  ;;  %v1681_v52 = vadd.f32 1.0, %v2687_v18 }
 0x7ef   :  { %2690 = vrcp.f32 %v1681_v52 }
 0x7fa   :  { %v2689_v53 = vpop.eup %2688 }
 0x7fb   :  { %v1689_v7 = vmul.f32 %v2689_v53, %v1687_v6 }
 0x7fc   :  { %v2691_v30 = vpop.eup %2690 }
 0x7fd   :  { %v1690_v48 = vadd.f32 %v1689_v7, %v4216_v49  ;;  %v1692_v12 = vsub.f32 1.0, %v2691_v30  ;;  %v1696_v11 = vmul.f32 %v2691_v30, %v1694_v54  ;;  %v2087_v49 = vld [vmem:[%s4127_s2 + $0xd0] ss:$0 sm:$0xff] }
 0x7ff   :  { %2692 = vtanh.f32 %v1690_v48 }
 0x80c   :  { %v2693_v10 = vpop.eup %2692 }
 0x80d   :  { %v1693_v55 = vmul.f32 %v2693_v10, %v1692_v12 }
 0x80f   :  { %v1697_v56 = vadd.f32 %v1696_v11, %v1693_v55 }
 0x811   :  { %v1730_v14 = vrot.slane %v1697_v56, 6 }
 0x813   :  { %2587 = vmatmul.mubr.f32.vlgmr.msra.gmra.mxu0 %v1730_v14 }
 0x8d3   :  { %v1798_v57 = vpop.f32.mrf.mxu0 }
 0x8d4   :  { %v1799_v60 = vadd.f32 %v2086_v62, %v1798_v57 }
 0x8d5   :  { %v2588_v9 = vpop.f32.mrf.mxu0 }
 0x8d6   :  { %vm1802_vm2 = vcmp.gt.f32.partialorder %v1799_v60, 0.0  ;;  %v1803_v22 = vmul.f32 0.01, %v1799_v60 }
 0x8d8   :  { %v1804_v24 = vsel %vm1802_vm2, %v1799_v60, %v1803_v22 }
 0x8d9   :  { %v1809_v25 = vmul.f32 %v2087_v49, %v1804_v24 }
 0x8da   :  { %2758 = dma.done.wait [#allocation3], 512 }
 0x8db   :  { %2759 = vsyncadd [#allocation3], 4294966784  ;;  %2590 = vmatpush3.msra.mxu1 %v4032_v1  ;;  %v4228_v26 = vld [vmem:[#allocation7_spill] sm:$0xff]  ;;  %v4229_v28 = vld [vmem:[#allocation8_spill] sm:$0xff]  ;;  %v2762_v33 = vmov 1966171168   ;;  %v1982_v18 = vstv %s4128_s3  ;;  %v4234_v24 = vlaneseq }
 0x8dc   :  { %2605 = vmatprep.mubr.msk.f32.mxu1 %vm1821_vm3, %v4228_v26  ;;  %2591 = vmatprep.subr.mxu1 %v4027_v63  ;;  %v4230_v31 = vld [vmem:[#allocation9_spill] sm:$0xff]  ;;  %v4231_v32 = vld [vmem:[#allocation10_spill] sm:$0xff]  ;;  %v1933_v34 = vunpack.c.l.s4 %v2762_v33  ;;  %v4232_v37 = vld [vmem:[#allocation19_spill] sm:$0xff]  ;;  %vm1968_vm7 = vcmask 261120   ;;  %vm2026_vm9 = vcmask 130112   ;;  %vm2037_vm10 = vcmask 1041409  }
 0x8dd   :  { %2592 = vmatpush3.msra.mxu1 %v4027_v63  ;;  %v4233_v8 = vld [vmem:[#allocation20_spill] sm:$0xff]  ;;  %vm2040_vm11 = vcmask 123904   ;;  %vm2044_vm12 = vcmask 1024  }
 0x8de   :  { %2593 = vmatprep.subr.mxu1 %v4022_v58  ;;  %v1934_v36 = vunpack.c.0.s8 %v1933_v34 }
 0x8df   :  { %2594 = vmatpush3.msra.mxu1 %v4022_v58 }
 0x8e0   :  { %2595 = vmatprep.subr.mxu1 %v4017_v0  ;;  %v1937_v39 = vsub.s32 %v1934_v36, %v4232_v37 }
 0x8e1   :  { %2596 = vmatpush3.msra.mxu1 %v4017_v0 }
 0x8e2   :  { %2597 = vmatprep.subr.mxu1 %v4012_v27 }
 0x8e3   :  { %2598 = vmatpush3.msra.mxu1 %v4012_v27 }
 0x8e4   :  { %2599 = vmatprep.subr.mxu1 %v4006_v13 }
 0x8e5   :  { %2600 = vmatpush3.msra.mxu1 %v4006_v13  ;;  %v1938_v13 = vrot.slane %v1809_v25, %v1937_v39  ;;  %v2016_v25 = vand.u32 127, %v4234_v24 }
 0x8e6   :  { %2601 = vmatprep.subr.mxu1 %v4001_v45 }
 0x8e7   :  { %2602 = vmatpush3.msra.mxu1 %v4001_v45  ;;  %v2088_v45 = vld [vmem:[%s4127_s2 + $0xc0] ss:$0 sm:$0xff]  ;;  %v1946_v58 = vrot.slane %v1938_v13, %v1937_v39  ;;  %v1939_v63 = vcombine.high %v1938_v13, %v1938_v13  ;;  %v2021_v26 = vadd.s32 4294967288, %v2016_v25  ;;  %v2019_v33 = vsub.s32 %v2016_v25, %v4232_v37 }
 0x8e8   :  { %2603 = vmatprep.subr.mxu1 %v3996_v40 }
 0x8e9   :  { %2604 = vmatpush3.msra.mxu1 %v3996_v40  ;;  %v1957_v16 = vrot.slane %v1946_v58, %v4233_v8  ;;  %v1953_v19 = vrot.slane %v1939_v63, %v1937_v39 }
 0x8ea   :  { %2606 = vmatmul.mubr.msk.f32.vlgmr.msra.gmra.mxu1 %vm1821_vm3, %v4229_v28  ;;  %v2024_v28 = vsub.s32 %v2021_v26, %v4232_v37 }
 0x8eb   :  { %2608 = vmatprep.mubr.msk.f32.mxu1 %vm1821_vm3, %v4230_v31  ;;  %v1961_v41 = vrot.slane %v1953_v19, %v4233_v8 }
 0x8ee   :  { %2609 = vmatmul.mubr.msk.f32.gmra.mxu1 %vm1821_vm3, %v4231_v32 }
 0x9aa   :  { %v2607_v40 = vpop.f32.mrf.mxu1 }
 0x9ab   :  { %v1906_v27 = vadd.f32 %v2607_v40, %v2088_v45 }
 0x9ac   :  { %v1900_v0 = vpop.f32.mrf.mxu1 }
 0x9ad   :  { %v1924_v1 = vmul.f32 0.01, %v1906_v27  ;;  %v1901_v21 = vadd.f32 %v2088_v45, %v1900_v0  ;;  %vm1920_vm4 = vcmp.gt.f32.partialorder %v1906_v27, 0.0 }
 0x9ae   :  { %v2610_v43 = vpop.f32.mrf.mxu1 }
 0x9af   :  { %v1923_v5 = vmul.f32 0.01, %v1901_v21  ;;  %v1916_v42 = vadd.f32 %v2610_v43, %v2088_v45  ;;  %vm1919_vm5 = vcmp.gt.f32.partialorder %v1901_v21, 0.0  ;;  %v1928_v35 = vsel %vm1920_vm4, %v1906_v27, %v1924_v1 }
 0x9b0   :  { %v1910_v29 = vpop.f32.mrf.mxu1  ;;  %v1965_v44 = vmul.f32 %v1957_v16, %v1928_v35 }
 0x9b1   :  { %v1926_v23 = vmul.f32 0.01, %v1916_v42  ;;  %v1911_v20 = vadd.f32 %v2088_v45, %v1910_v29  ;;  %v1927_v59 = vsel %vm1919_vm5, %v1901_v21, %v1923_v5  ;;  %vm1922_vm6 = vcmp.gt.f32.partialorder %v1916_v42, 0.0 }
 0x9b2   :  { %v1964_v46 = vmul.f32 %v1957_v16, %v1927_v59  ;;  %v1972_v4 = vsel %vm1968_vm7, %v1965_v44, 0.0 }
 0x9b3   :  { %v1925_v38 = vmul.f32 0.01, %v1911_v20  ;;  %vm1921_vm8 = vcmp.gt.f32.partialorder %v1911_v20, 0.0  ;;  %v1930_v47 = vsel %vm1922_vm6, %v1916_v42, %v1926_v23 }
 0x9b4   :  { %v1969_v61 = vsel %vm1968_vm7, %v1964_v46, 0.0  ;;  %v1967_v3 = vmul.f32 %v1961_v41, %v1930_v47 }
 0x9b5   :  { %1970 = vadd.xlane.f32.xlu0 %v1969_v61  ;;  %v1929_v15 = vsel %vm1921_vm8, %v1911_v20, %v1925_v38 }
 0x9b6   :  { %v1966_v17 = vmul.f32 %v1961_v41, %v1929_v15  ;;  %v1978_v51 = vsel %vm1968_vm7, %v1967_v3, 0.0 }
 0x9b8   :  { %v1975_v50 = vsel %vm1968_vm7, %v1966_v17, 0.0 }
 0x9b9   :  { %1976 = vadd.xlane.f32.xlu1 %v1975_v50  ;;  %1973 = vadd.xlane.f32.xlu0 %v1972_v4 }
 0x9bd   :  { %1979 = vadd.xlane.f32.xlu1 %v1978_v51 }
 0xa3e   :  { %v1971_v2 = vpop.xlane.xlu0 %1970 }
 0xa3f   :  { %v1983_v52 = vadd.f32 %v1982_v18, %v1971_v2 }
 0xa41   :  { %v2093_v6 = vmul.f32 -1.442695, %v1983_v52 }
 0xa42   :  { %v1977_v53 = vpop.xlane.xlu1 %1976  ;;  %v1974_v7 = vpop.xlane.xlu0 %1973 }
 0xa43   :  { %2742 = vpow2.f32 %v2093_v6  ;;  %v1985_v48 = vadd.f32 %v1982_v18, %v1977_v53  ;;  %v1984_v30 = vadd.f32 %v1982_v18, %v1974_v7 }
 0xa45   :  { %v2095_v54 = vmul.f32 -1.442695, %v1985_v48  ;;  %v2094_v12 = vmul.f32 -1.442695, %v1984_v30 }
 0xa46   :  { %v1980_v10 = vpop.xlane.xlu1 %1979 }
 0xa47   :  { %2744 = vpow2.f32 %v2095_v54  ;;  %v1986_v55 = vadd.f32 %v1982_v18, %v1980_v10 }
 0xa48   :  { %2746 = vpow2.f32 %v2094_v12 }
 0xa49   :  { %v2096_v11 = vmul.f32 -1.442695, %v1986_v55 }
 0xa4b   :  { %2748 = vpow2.f32 %v2096_v11 }
 0xa50   :  { %v2743_v56 = vpop.eup %2742 }
 0xa51   :  { %v1999_v14 = vadd.f32 1.0, %v2743_v56 }
 0xa53   :  { %2750 = vrcp.f32 %v1999_v14 }
 0xa54   :  { %v2745_v62 = vpop.eup %2744 }
 0xa55   :  { %v2747_v57 = vpop.eup %2746  ;;  %v2001_v60 = vadd.f32 1.0, %v2745_v62 }
 0xa56   :  { %v2000_v9 = vadd.f32 1.0, %v2747_v57 }
 0xa58   :  { %v2749_v49 = vpop.eup %2748  ;;  %2752 = vrcp.f32 %v2000_v9 }
 0xa59   :  { %2754 = vrcp.f32 %v2001_v60  ;;  %v2002_v22 = vadd.f32 1.0, %v2749_v49 }
 0xa5b   :  { %2756 = vrcp.f32 %v2002_v22 }
 0xa60   :  { %v2751_v31 = vpop.eup %2750 }
 0xa61   :  { %v2020_v45 = vrot.slane %v2751_v31, %v2019_v33 }
 0xa65   :  { %v2753_v32 = vpop.eup %2752 }
 0xa66   :  { %v2755_v34 = vpop.eup %2754  ;;  %v2025_v36 = vrot.slane %v2753_v32, %v2024_v28 }
 0xa67   :  { %v2031_v13 = vrot.slane %v2755_v34, %v2019_v33 }
 0xa68   :  { %v2757_v39 = vpop.eup %2756  ;;  %v2027_v27 = vsel %vm2026_vm9, %v2025_v36, %v2020_v45 }
 0xa69   :  { %v2035_v40 = vrot.slane %v2757_v39, %v2024_v28 }
 0xa6b   :  { %v2036_v0 = vsel %vm2026_vm9, %v2035_v40, %v2031_v13 }
 0xa6c   :  { %v2038_v58 = vsel %vm2037_vm10, %v2036_v0, %v2027_v27 }
 0xa6d   :  { %v2041_v63 = vsel %vm2040_vm11, %v2038_v58, 0.0 }
 0xa6e   :  { %2042 = vadd.xlane.f32.xlu0 %v2041_v63 }
 0xaf7   :  { %v2043_v1 = vpop.xlane.xlu0 %2042 }
 0xaf8   :  { %2045 = vst.msk [vmem:[%s4130_s5] sm:$0x3] %vm2044_vm12, %v2043_v1 }
 0xaf9   :  { %2050 = vsyncmov [#allocation3] }
 0xafc   :  { %s2051_s1 = vpop.sfrf %2050 }
 0xafd   :  { %p2097_p0 = scmp.ne.s32.totalorder %s2051_s1, 0 }
 0xaff   :  { %2055 = shalt.err (%p2097_p0)  }

</bundles_post_ra>
